<compile_context>
chip_gen: v5e
topology: v5e:2x2
jax: 0.10.0
libtpu: 0.0.40
codegen_flags: <defaults>
</compile_context>

<pallas_src>
import jax
import jax.numpy as jnp
from jax.experimental import pallas as pl
from jax.experimental.pallas import tpu as pltpu

DECAY = 0.9
EVAL_HIDDEN = 128    # eval_head hidden width      (Linear(V, 128))
DISC_HIDDEN = 64     # discriminator hidden width  (Linear(2V, 64))
LANE = 128
NEG_FILL = -1e30     # bias fill for padded vocab columns -> exp() == 0 in softmax


def _round_up(n, m):
    return ((n + m - 1) // m) * m


def _sigmoid(z):
    # tanh-based sigmoid keeps the transcendental on the (otherwise idle) EUP slot.
    return 0.5 * (jnp.tanh(0.5 * z) + 1.0)


def _make_kernel(Hp, Vp):
    E1 = EVAL_HIDDEN
    D1 = _round_up(DISC_HIDDEN, LANE)

    def kernel(slab_ref,
               wxc_ref, bxc_ref,     # (Hp, Vp+Hp), (1, Vp+Hp): [sim_head | fusion_gate(x)]
               wpc_ref, bpc_ref,     # (Vp, E1+D1), (1, E1+D1): [eval_head[0] | disc[0](sim)]
               wd1e_ref,             # (Vp, D1): disc[0] expected-probs part
               we2_ref, be2_ref,     # (1, E1), (1, 1): eval_head[2] as a row
               wfr_ref,              # (1, Hp): fusion_gate reward column
               wd2_ref, bd2_ref,     # (1, D1), (1, 1): discriminator[2] as a row
               wg_ref, bg_ref,       # (1, Hp), (1, Hp): feedback gate Linear(1, H)
               out_ref):
        # Lane-dense input slab, all segment boundaries 128-aligned.
        x = slab_ref[:, :Hp]
        exp_p = slab_ref[:, Hp:Hp + Vp]
        trace = slab_ref[:, Hp + Vp:Hp + Vp + 1]

        # ---- fused MXU pass on x: sim_head logits | fusion_gate x-part -------
        xc = jnp.dot(x, wxc_ref[...], preferred_element_type=jnp.float32) + bxc_ref[...]
        logits = xc[:, :Vp]              # padded vocab cols carry bias = NEG_FILL
        fuse_x = xc[:, Vp:]

        # ---- exact softmax over the (padded) vocab --------------------------
        m = jnp.max(logits, axis=-1, keepdims=True)
        e = jnp.exp(logits - m)                      # padded cols -> exp() == 0
        denom = jnp.sum(e, axis=-1, keepdims=True)
        probs = e * pl.reciprocal(denom, approx=False)   # EUP recip, not VALU divide

        # ---- fused MXU pass on probs: eval_head[0] | disc[0] sim-part --------
        hc = jnp.dot(probs, wpc_ref[...], preferred_element_type=jnp.float32) + bpc_ref[...]
        h1 = jnp.maximum(hc[:, :E1], 0.0)    # ReLU only on the eval-head part
        d_sim = hc[:, E1:]                   # disc hidden pre-activation (sim part + b_d1)

        # ---- eval_head[2]: (TM,128)x(128,1) as VPU mul + XLU lane reduce -----
        rewards = _sigmoid(
            jnp.sum(h1 * we2_ref[...], axis=-1, keepdims=True) + be2_ref[...])
        adjusted = fuse_x + rewards * wfr_ref[...]

        # ---- comparator / discriminator --------------------------------------
        d1 = jnp.maximum(
            d_sim + jnp.dot(exp_p, wd1e_ref[...], preferred_element_type=jnp.float32),
            0.0)
        score = _sigmoid(
            jnp.sum(d1 * wd2_ref[...], axis=-1, keepdims=True) + bd2_ref[...])

        # ---- astro trace update + feedback gate (Linear(1, H) broadcast) -----
        new_trace = DECAY * trace + (1.0 - DECAY) * score
        x_out = adjusted + new_trace * wg_ref[...] + bg_ref[...]

        # ---- one lane-dense full-block store: [x_out | probs | (trace, score)]
        rows = x_out.shape[0]
        lane = jax.lax.broadcasted_iota(jnp.int32, (rows, LANE), 1)
        tail = jnp.where(lane == 0, new_trace, jnp.where(lane == 1, score, 0.0))
        out_ref[...] = jnp.concatenate([x_out, probs, tail], axis=-1)

    return kernel


def _vmem_capacity_bytes():
    try:
        return int(pltpu.get_tpu_info().vmem_capacity_bytes)
    except Exception:
        return 64 * 2**20        # conservative (v7x-class) fallback


def _pick_tile_rows(m_rows, per_row_bytes, weight_bytes, budget, min_steps):
    """Largest row tile (power of two, >=8) whose pipelined footprint fits `budget`."""
    cover = _round_up(max(m_rows, 8), 8)
    best = 8
    for tm in (8, 16, 32, 64, 128, 256, 512, 1024):
        if tm > cover:                                   # don't pad far past one tile
            break
        if 2 * tm * per_row_bytes + weight_bytes + (2 << 20) > budget:
            break
        best = tm
    # Keep >= min_steps grid steps when the problem is big enough so the
    # DMA/compute pipeline actually overlaps (>= 2 steps per TC on v7x).
    while best > 8 and -(-m_rows // best) < min_steps and m_rows >= 8 * min_steps:
        best //= 2
    return best


def _pad_cols(a, n, value=0.0):
    pad = n - a.shape[1]
    if pad == 0:
        return a
    return jnp.pad(a, ((0, 0), (0, pad)), constant_values=value)


def _pad_rows(a, n):
    pad = n - a.shape[0]
    if pad == 0:
        return a
    return jnp.pad(a, ((0, pad), (0, 0)))


def astro_transformer_block(x, expected_probs, astro_trace, params):
    B, S, H = x.shape
    V = expected_probs.shape[-1]
    M = B * S

    Hp = _round_up(H, LANE)
    Vp = _round_up(V, LANE)
    E1 = EVAL_HIDDEN
    D1 = _round_up(DISC_HIDDEN, LANE)
    WIDTH = Hp + Vp + LANE           # lane-dense slab width (inputs and outputs)

    # ---- one-time weight re-layout / fusion / 128-lane padding (outside kernel)
    w_sim = _pad_rows(_pad_cols(params["w_sim"], Vp), Hp)            # (Hp, Vp)
    b_sim = _pad_cols(params["b_sim"], Vp, NEG_FILL)                 # (1, Vp)
    w_fx = _pad_rows(_pad_cols(params["w_fx"], Hp), Hp)              # (Hp, Hp)
    b_f = _pad_cols(params["b_f"], Hp)                               # (1, Hp)
    w_xc = jnp.concatenate([w_sim, w_fx], axis=1)                    # (Hp, Vp+Hp)
    b_xc = jnp.concatenate([b_sim, b_f], axis=1)                     # (1, Vp+Hp)

    w_e1 = _pad_rows(params["w_e1"], Vp)                             # (Vp, 128)
    w_d1s = _pad_rows(_pad_cols(params["w_d1s"], D1), Vp)            # (Vp, D1)
    w_pc = jnp.concatenate([w_e1, w_d1s], axis=1)                    # (Vp, E1+D1)
    b_pc = jnp.concatenate([params["b_e1"], _pad_cols(params["b_d1"], D1)], axis=1)

    w_d1e = _pad_rows(_pad_cols(params["w_d1e"], D1), Vp)            # (Vp, D1)
    we2 = params["w_e2"].T                                           # (1, 128)
    wd2 = _pad_cols(params["w_d2"].T, D1)                            # (1, D1)
    w_fr = _pad_cols(params["w_fr"], Hp)                             # (1, Hp)
    w_g = _pad_cols(params["w_g"], Hp)                               # (1, Hp)
    b_g = _pad_cols(params["b_g"], Hp)                               # (1, Hp)

    weights = (w_xc, b_xc, w_pc, b_pc, w_d1e, we2, params["b_e2"],
               w_fr, wd2, params["b_d2"], w_g, b_g)

    # ---- lane-dense input slab: [x | expected_probs | trace], 128-aligned segments
    in_slab = jnp.concatenate([
        _pad_cols(x.reshape(M, H), Hp),
        _pad_cols(expected_probs.reshape(M, V), Vp),
        _pad_cols(astro_trace.reshape(M, 1), LANE),
    ], axis=1)                                                       # (M, WIDTH)

    # ---- tiling: big tiles first, then pad rows up to a multiple of the tile
    vmem_cap = _vmem_capacity_bytes()
    budget = int(vmem_cap * 0.75) - (4 << 20)       # ~44 MiB on v7x, ~92 MiB on v5e/v6e
    min_steps = 4 if vmem_cap <= 80 * 2**20 else 2  # v7x: >= 2 grid steps per TensorCore
    per_row_bytes = 4 * 2 * WIDTH                   # f32 input + output slab per row
    weight_bytes = 4 * sum(int(w.size) for w in weights)
    # TODO(synk): if weight_bytes ever exceeds ~half the per-TC VMEM budget (very
    # large V*H), add a second grid axis that column-tiles w_xc instead of
    # requiring full weight residency.
    TM = _pick_tile_rows(M, per_row_bytes, weight_bytes, budget, min_steps)
    Mp = _round_up(max(M, TM), TM)
    grid = (Mp // TM,)

    if Mp != M:
        in_slab = jnp.pad(in_slab, ((0, Mp - M), (0, 0)))

    kernel = _make_kernel(Hp, Vp)
    row_spec = pl.BlockSpec((TM, WIDTH), lambda i: (i, 0))
    out_shape = jax.ShapeDtypeStruct((Mp, WIDTH), jnp.float32)

    flops = 2 * Mp * (Hp * (Vp + Hp) + Vp * (E1 + 2 * D1)) + 20 * Mp * WIDTH
    transcendentals = Mp * (Vp + 4)
    bytes_accessed = Mp * per_row_bytes + weight_bytes

    def build(single_buffer_weights):
        def w_spec(w):
            if single_buffer_weights:
                # Constant index_map -> block never re-fetched; one buffer suffices.
                return pl.BlockSpec(w.shape, lambda i: (0, 0),
                                    pipeline_mode=pl.Buffered(1))
            return pl.BlockSpec(w.shape, lambda i: (0, 0))

        w_mult = 1 if single_buffer_weights else 2
        vmem_need = 2 * TM * per_row_bytes + w_mult * weight_bytes + (4 << 20)
        # Never clamp below the computed need (only below physical capacity).
        vmem_limit = int(min(max(vmem_need, 32 * 2**20), vmem_cap - (2 << 20)))

        return pl.pallas_call(
            kernel,
            grid=grid,
            in_specs=[row_spec] + [w_spec(w) for w in weights],
            out_specs=row_spec,
            out_shape=out_shape,
            compiler_params=pltpu.CompilerParams(
                dimension_semantics=("parallel",),     # shard row tiles across TCs
                vmem_limit_bytes=vmem_limit),
            cost_estimate=pl.CostEstimate(
                flops=flops, transcendentals=transcendentals,
                bytes_accessed=bytes_accessed),
        )

    try:
        out_slab = build(True)(in_slab, *weights)
    except Exception:
        # pipeline_mode=pl.Buffered(1) unsupported on this jax/Mosaic version.
        out_slab = build(False)(in_slab, *weights)

    out_slab = out_slab[:M]
    x_out = out_slab[:, :H]
    sim_probs = out_slab[:, Hp:Hp + V]
    new_trace = out_slab[:, Hp + Vp:Hp + Vp + 1]
    comp_score = out_slab[:, Hp + Vp + 1:Hp + Vp + 2]

    return (x_out.reshape(B, S, H),
            new_trace.reshape(B, S, 1),
            sim_probs.reshape(B, S, V),
            comp_score.reshape(B, S, 1))


def init_params(key, hidden_dim, vocab_size):
    """Deterministic synthetic parameters; linear weights stored as (in, out)."""
    def lin(k, fan_in, fan_out):
        kw, kb = jax.random.split(k)
        bound = 1.0 / jnp.sqrt(fan_in)
        w = jax.random.uniform(kw, (fan_in, fan_out), jnp.float32, -bound, bound)
        b = jax.random.uniform(kb, (1, fan_out), jnp.float32, -bound, bound)
        return w, b

    keys = jax.random.split(key, 6)
    H, V = hidden_dim, vocab_size

    w_sim, b_sim = lin(keys[0], H, V)               # sim_head: Linear(H, V)
    w_e1, b_e1 = lin(keys[1], V, EVAL_HIDDEN)       # eval_head[0]: Linear(V, 128)
    w_e2, b_e2 = lin(keys[2], EVAL_HIDDEN, 1)       # eval_head[2]: Linear(128, 1)
    w_f, b_f = lin(keys[3], H + 1, H)               # fusion_gate: Linear(H+1, H)
    w_d1, b_d1 = lin(keys[4], 2 * V, DISC_HIDDEN)   # discriminator[0]: Linear(2V, 64)
    w_d2, b_d2 = lin(keys[5], DISC_HIDDEN, 1)       # discriminator[2]: Linear(64, 1)
    kg = jax.random.fold_in(key, 7)
    w_g, b_g = lin(kg, 1, H)                        # feedback gate: Linear(1, H)

    return {
        "w_sim": w_sim, "b_sim": b_sim,
        "w_e1": w_e1, "b_e1": b_e1,
        "w_e2": w_e2, "b_e2": b_e2,
        "w_fx": w_f[:H, :], "w_fr": w_f[H:H + 1, :], "b_f": b_f,
        "w_d1s": w_d1[:V, :], "w_d1e": w_d1[V:, :], "b_d1": b_d1,
        "w_d2": w_d2, "b_d2": b_d2,
        "w_g": w_g, "b_g": b_g,
    }


def reference(x, expected_probs, astro_trace, params):
    """Plain-JAX reference mirroring the PyTorch forward."""
    logits = x @ params["w_sim"] + params["b_sim"]
    probs = jax.nn.softmax(logits, axis=-1)
    h1 = jnp.maximum(probs @ params["w_e1"] + params["b_e1"], 0.0)
    rewards = jax.nn.sigmoid(h1 @ params["w_e2"] + params["b_e2"])
    adjusted = x @ params["w_fx"] + rewards * params["w_fr"] + params["b_f"]
    d1 = jnp.maximum(
        probs @ params["w_d1s"] + expected_probs @ params["w_d1e"] + params["b_d1"], 0.0
    )
    score = jax.nn.sigmoid(d1 @ params["w_d2"] + params["b_d2"])
    new_trace = DECAY * astro_trace + (1.0 - DECAY) * score
    x_out = adjusted + (new_trace * params["w_g"] + params["b_g"])
    return x_out, new_trace, probs, score


if __name__ == "__main__":
    batch_size, seq_len, hidden_dim, vocab_size = 2, 8, 32, 16

    key = jax.random.PRNGKey(0)
    k_x, k_ids, k_p = jax.random.split(key, 3)

    x = jax.random.normal(k_x, (batch_size, seq_len, hidden_dim), jnp.float32)
    expected_ids = jax.random.randint(k_ids, (batch_size, seq_len), 0, vocab_size)
    expected_probs = jax.nn.one_hot(expected_ids, vocab_size, dtype=jnp.float32)
    astro_trace = jnp.zeros((batch_size, seq_len, 1), jnp.float32)

    params = init_params(k_p, hidden_dim, vocab_size)

    outs = astro_transformer_block(x, expected_probs, astro_trace, params)
    outs = jax.block_until_ready(outs)

    # correctness check vs plain-JAX reference
    refs = reference(x, expected_probs, astro_trace, params)
    for o, r in zip(outs, refs):
        assert o.shape == r.shape
        assert jnp.max(jnp.abs(o - r)) < 5e-5

    print("KERNEL_OK")
</pallas_src>

<mosaic_0001>
module attributes {stable_mosaic.version = 11 : i64} {
  func.func @kernel(%arg0: i32, %arg1: memref<16x384xf32, #tpu.memory_space<vmem>>, %arg2: memref<128x256xf32, #tpu.memory_space<vmem>>, %arg3: memref<1x256xf32, #tpu.memory_space<vmem>>, %arg4: memref<128x256xf32, #tpu.memory_space<vmem>>, %arg5: memref<1x256xf32, #tpu.memory_space<vmem>>, %arg6: memref<128x128xf32, #tpu.memory_space<vmem>>, %arg7: memref<1x128xf32, #tpu.memory_space<vmem>>, %arg8: memref<1x1xf32, #tpu.memory_space<vmem>>, %arg9: memref<1x128xf32, #tpu.memory_space<vmem>>, %arg10: memref<1x128xf32, #tpu.memory_space<vmem>>, %arg11: memref<1x1xf32, #tpu.memory_space<vmem>>, %arg12: memref<1x128xf32, #tpu.memory_space<vmem>>, %arg13: memref<1x128xf32, #tpu.memory_space<vmem>>, %arg14: memref<16x384xf32, #tpu.memory_space<vmem>>) attributes {dimension_semantics = [#tpu.dimension_semantics<parallel>], iteration_bounds = array<i64: 1>, scalar_prefetch = 0 : i64, scratch_operands = 0 : i64, tpu.core_type = #tpu.core_type<tc>, window_params = [{transform_indices = @transform_0, window_bounds = array<i64: 16, 384>}, {pipeline_mode = #tpu.pipeline_mode<synchronous>, transform_indices = @transform_1, window_bounds = array<i64: 128, 256>}, {pipeline_mode = #tpu.pipeline_mode<synchronous>, transform_indices = @transform_2, window_bounds = array<i64: 1, 256>}, {pipeline_mode = #tpu.pipeline_mode<synchronous>, transform_indices = @transform_3, window_bounds = array<i64: 128, 256>}, {pipeline_mode = #tpu.pipeline_mode<synchronous>, transform_indices = @transform_4, window_bounds = array<i64: 1, 256>}, {pipeline_mode = #tpu.pipeline_mode<synchronous>, transform_indices = @transform_5, window_bounds = array<i64: 128, 128>}, {pipeline_mode = #tpu.pipeline_mode<synchronous>, transform_indices = @transform_6, window_bounds = array<i64: 1, 128>}, {pipeline_mode = #tpu.pipeline_mode<synchronous>, transform_indices = @transform_7, window_bounds = array<i64: 1, 1>}, {pipeline_mode = #tpu.pipeline_mode<synchronous>, transform_indices = @transform_8, window_bounds = array<i64: 1, 128>}, {pipeline_mode = #tpu.pipeline_mode<synchronous>, transform_indices = @transform_9, window_bounds = array<i64: 1, 128>}, {pipeline_mode = #tpu.pipeline_mode<synchronous>, transform_indices = @transform_10, window_bounds = array<i64: 1, 1>}, {pipeline_mode = #tpu.pipeline_mode<synchronous>, transform_indices = @transform_11, window_bounds = array<i64: 1, 128>}, {pipeline_mode = #tpu.pipeline_mode<synchronous>, transform_indices = @transform_12, window_bounds = array<i64: 1, 128>}, {transform_indices = @transform_13, window_bounds = array<i64: 16, 384>}]} {
    %c0 = arith.constant 0 : index
    %c0_0 = arith.constant 0 : index
    %0 = vector.load %arg1[%c0, %c0_0] : memref<16x384xf32, #tpu.memory_space<vmem>>, vector<16x128xf32>
    %c0_1 = arith.constant 0 : index
    %c128 = arith.constant 128 : index
    %1 = vector.load %arg1[%c0_1, %c128] : memref<16x384xf32, #tpu.memory_space<vmem>>, vector<16x128xf32>
    %c0_2 = arith.constant 0 : index
    %c256 = arith.constant 256 : index
    %2 = vector.load %arg1[%c0_2, %c256] : memref<16x384xf32, #tpu.memory_space<vmem>>, vector<16x1xf32>
    %c0_3 = arith.constant 0 : index
    %c0_4 = arith.constant 0 : index
    %3 = vector.load %arg2[%c0_3, %c0_4] : memref<128x256xf32, #tpu.memory_space<vmem>>, vector<128x256xf32>
    %cst = arith.constant dense<0.000000e+00> : vector<16x256xf32>
    %4 = tpu.matmul %0, %3, %cst {dimension_numbers = #tpu.dot_dimension_numbers<[1], [0], [0], [1], [0, 0, 1, 1], [], []>} : vector<16x128xf32>, vector<128x256xf32>, vector<16x256xf32> -> vector<16x256xf32>
    %c0_5 = arith.constant 0 : index
    %c0_6 = arith.constant 0 : index
    %5 = vector.load %arg3[%c0_5, %c0_6] : memref<1x256xf32, #tpu.memory_space<vmem>>, vector<1x256xf32>
    %6 = vector.broadcast %5 : vector<1x256xf32> to vector<16x256xf32>
    %7 = arith.addf %4, %6 : vector<16x256xf32>
    %8 = vector.extract_strided_slice %7 {offsets = [0, 0], sizes = [16, 128], strides = [1, 1]} : vector<16x256xf32> to vector<16x128xf32>
    %9 = vector.extract_strided_slice %7 {offsets = [0, 128], sizes = [16, 128], strides = [1, 1]} : vector<16x256xf32> to vector<16x128xf32>
    %cst_7 = arith.constant dense<0xFF800000> : vector<16xf32>
    %10 = vector.multi_reduction <maximumf>, %8, %cst_7 [1] : vector<16x128xf32> to vector<16xf32>
    %11 = vector.shape_cast %10 : vector<16xf32> to vector<16x1xf32>
    %12 = vector.broadcast %11 : vector<16x1xf32> to vector<16x128xf32>
    %13 = arith.subf %8, %12 : vector<16x128xf32>
    %14 = math.exp %13 : vector<16x128xf32>
    %cst_8 = arith.constant dense<0.000000e+00> : vector<16xf32>
    %15 = vector.multi_reduction <add>, %14, %cst_8 [1] : vector<16x128xf32> to vector<16xf32>
    %16 = vector.shape_cast %15 : vector<16xf32> to vector<16x1xf32>
    %17 = tpu.reciprocal %16 : vector<16x1xf32> -> vector<16x1xf32>
    %18 = vector.broadcast %17 : vector<16x1xf32> to vector<16x128xf32>
    %19 = arith.mulf %14, %18 : vector<16x128xf32>
    %c0_9 = arith.constant 0 : index
    %c0_10 = arith.constant 0 : index
    %20 = vector.load %arg4[%c0_9, %c0_10] : memref<128x256xf32, #tpu.memory_space<vmem>>, vector<128x256xf32>
    %cst_11 = arith.constant dense<0.000000e+00> : vector<16x256xf32>
    %21 = tpu.matmul %19, %20, %cst_11 {dimension_numbers = #tpu.dot_dimension_numbers<[1], [0], [0], [1], [0, 0, 1, 1], [], []>} : vector<16x128xf32>, vector<128x256xf32>, vector<16x256xf32> -> vector<16x256xf32>
    %c0_12 = arith.constant 0 : index
    %c0_13 = arith.constant 0 : index
    %22 = vector.load %arg5[%c0_12, %c0_13] : memref<1x256xf32, #tpu.memory_space<vmem>>, vector<1x256xf32>
    %23 = vector.broadcast %22 : vector<1x256xf32> to vector<16x256xf32>
    %24 = arith.addf %21, %23 : vector<16x256xf32>
    %25 = vector.extract_strided_slice %24 {offsets = [0, 0], sizes = [16, 128], strides = [1, 1]} : vector<16x256xf32> to vector<16x128xf32>
    %cst_14 = arith.constant 0.000000e+00 : f32
    %26 = vector.broadcast %cst_14 : f32 to vector<16x128xf32>
    %27 = arith.maximumf %25, %26 : vector<16x128xf32>
    %28 = vector.extract_strided_slice %24 {offsets = [0, 128], sizes = [16, 128], strides = [1, 1]} : vector<16x256xf32> to vector<16x128xf32>
    %c0_15 = arith.constant 0 : index
    %c0_16 = arith.constant 0 : index
    %29 = vector.load %arg7[%c0_15, %c0_16] : memref<1x128xf32, #tpu.memory_space<vmem>>, vector<1x128xf32>
    %30 = vector.broadcast %29 : vector<1x128xf32> to vector<16x128xf32>
    %31 = arith.mulf %27, %30 : vector<16x128xf32>
    %cst_17 = arith.constant dense<0.000000e+00> : vector<16xf32>
    %32 = vector.multi_reduction <add>, %31, %cst_17 [1] : vector<16x128xf32> to vector<16xf32>
    %33 = vector.shape_cast %32 : vector<16xf32> to vector<16x1xf32>
    %c0_18 = arith.constant 0 : index
    %c0_19 = arith.constant 0 : index
    %34 = vector.load %arg8[%c0_18, %c0_19] : memref<1x1xf32, #tpu.memory_space<vmem>>, vector<1x1xf32>
    %35 = vector.broadcast %34 : vector<1x1xf32> to vector<16x1xf32>
    %36 = arith.addf %33, %35 : vector<16x1xf32>
    %cst_20 = arith.constant 5.000000e-01 : f32
    %37 = vector.broadcast %cst_20 : f32 to vector<16x1xf32>
    %38 = arith.mulf %37, %36 : vector<16x1xf32>
    %39 = math.tanh %38 : vector<16x1xf32>
    %cst_21 = arith.constant 1.000000e+00 : f32
    %40 = vector.broadcast %cst_21 : f32 to vector<16x1xf32>
    %41 = arith.addf %39, %40 : vector<16x1xf32>
    %cst_22 = arith.constant 5.000000e-01 : f32
    %42 = vector.broadcast %cst_22 : f32 to vector<16x1xf32>
    %43 = arith.mulf %42, %41 : vector<16x1xf32>
    %c0_23 = arith.constant 0 : index
    %c0_24 = arith.constant 0 : index
    %44 = vector.load %arg9[%c0_23, %c0_24] : memref<1x128xf32, #tpu.memory_space<vmem>>, vector<1x128xf32>
    %45 = vector.broadcast %43 : vector<16x1xf32> to vector<16x128xf32>
    %46 = vector.broadcast %44 : vector<1x128xf32> to vector<16x128xf32>
    %47 = arith.mulf %45, %46 : vector<16x128xf32>
    %48 = arith.addf %9, %47 : vector<16x128xf32>
    %c0_25 = arith.constant 0 : index
    %c0_26 = arith.constant 0 : index
    %49 = vector.load %arg6[%c0_25, %c0_26] : memref<128x128xf32, #tpu.memory_space<vmem>>, vector<128x128xf32>
    %cst_27 = arith.constant dense<0.000000e+00> : vector<16x128xf32>
    %50 = tpu.matmul %1, %49, %cst_27 {dimension_numbers = #tpu.dot_dimension_numbers<[1], [0], [0], [1], [0, 0, 1, 1], [], []>} : vector<16x128xf32>, vector<128x128xf32>, vector<16x128xf32> -> vector<16x128xf32>
    %51 = arith.addf %28, %50 : vector<16x128xf32>
    %cst_28 = arith.constant 0.000000e+00 : f32
    %52 = vector.broadcast %cst_28 : f32 to vector<16x128xf32>
    %53 = arith.maximumf %51, %52 : vector<16x128xf32>
    %c0_29 = arith.constant 0 : index
    %c0_30 = arith.constant 0 : index
    %54 = vector.load %arg10[%c0_29, %c0_30] : memref<1x128xf32, #tpu.memory_space<vmem>>, vector<1x128xf32>
    %55 = vector.broadcast %54 : vector<1x128xf32> to vector<16x128xf32>
    %56 = arith.mulf %53, %55 : vector<16x128xf32>
    %cst_31 = arith.constant dense<0.000000e+00> : vector<16xf32>
    %57 = vector.multi_reduction <add>, %56, %cst_31 [1] : vector<16x128xf32> to vector<16xf32>
    %58 = vector.shape_cast %57 : vector<16xf32> to vector<16x1xf32>
    %c0_32 = arith.constant 0 : index
    %c0_33 = arith.constant 0 : index
    %59 = vector.load %arg11[%c0_32, %c0_33] : memref<1x1xf32, #tpu.memory_space<vmem>>, vector<1x1xf32>
    %60 = vector.broadcast %59 : vector<1x1xf32> to vector<16x1xf32>
    %61 = arith.addf %58, %60 : vector<16x1xf32>
    %cst_34 = arith.constant 5.000000e-01 : f32
    %62 = vector.broadcast %cst_34 : f32 to vector<16x1xf32>
    %63 = arith.mulf %62, %61 : vector<16x1xf32>
    %64 = math.tanh %63 : vector<16x1xf32>
    %cst_35 = arith.constant 1.000000e+00 : f32
    %65 = vector.broadcast %cst_35 : f32 to vector<16x1xf32>
    %66 = arith.addf %64, %65 : vector<16x1xf32>
    %cst_36 = arith.constant 5.000000e-01 : f32
    %67 = vector.broadcast %cst_36 : f32 to vector<16x1xf32>
    %68 = arith.mulf %67, %66 : vector<16x1xf32>
    %cst_37 = arith.constant 0.899999976 : f32
    %69 = vector.broadcast %cst_37 : f32 to vector<16x1xf32>
    %70 = arith.mulf %69, %2 : vector<16x1xf32>
    %cst_38 = arith.constant 1.000000e-01 : f32
    %71 = vector.broadcast %cst_38 : f32 to vector<16x1xf32>
    %72 = arith.mulf %71, %68 : vector<16x1xf32>
    %73 = arith.addf %70, %72 : vector<16x1xf32>
    %c0_39 = arith.constant 0 : index
    %c0_40 = arith.constant 0 : index
    %74 = vector.load %arg12[%c0_39, %c0_40] : memref<1x128xf32, #tpu.memory_space<vmem>>, vector<1x128xf32>
    %75 = vector.broadcast %73 : vector<16x1xf32> to vector<16x128xf32>
    %76 = vector.broadcast %74 : vector<1x128xf32> to vector<16x128xf32>
    %77 = arith.mulf %75, %76 : vector<16x128xf32>
    %78 = arith.addf %48, %77 : vector<16x128xf32>
    %c0_41 = arith.constant 0 : index
    %c0_42 = arith.constant 0 : index
    %79 = vector.load %arg13[%c0_41, %c0_42] : memref<1x128xf32, #tpu.memory_space<vmem>>, vector<1x128xf32>
    %80 = vector.broadcast %79 : vector<1x128xf32> to vector<16x128xf32>
    %81 = arith.addf %78, %80 : vector<16x128xf32>
    %82 = tpu.iota {dimensions = array<i32: 1>} : vector<16x128xi32>
    %c0_i32 = arith.constant 0 : i32
    %83 = vector.broadcast %c0_i32 : i32 to vector<16x128xi32>
    %84 = arith.cmpi eq, %82, %83 : vector<16x128xi32>
    %c1_i32 = arith.constant 1 : i32
    %85 = vector.broadcast %c1_i32 : i32 to vector<16x128xi32>
    %86 = arith.cmpi eq, %82, %85 : vector<16x128xi32>
    %cst_43 = arith.constant 0.000000e+00 : f32
    %87 = vector.shape_cast %68 : vector<16x1xf32> to vector<16x1xf32>
    %88 = vector.broadcast %87 : vector<16x1xf32> to vector<16x128xf32>
    %89 = vector.broadcast %cst_43 : f32 to vector<16x128xf32>
    %90 = arith.select %86, %88, %89 : vector<16x128xi1>, vector<16x128xf32>
    %91 = vector.shape_cast %73 : vector<16x1xf32> to vector<16x1xf32>
    %92 = vector.broadcast %91 : vector<16x1xf32> to vector<16x128xf32>
    %93 = arith.select %84, %92, %90 : vector<16x128xi1>, vector<16x128xf32>
    %94 = tpu.concatenate %81, %19, %93 in 1 : vector<16x128xf32>, vector<16x128xf32>, vector<16x128xf32> -> vector<16x384xf32>
    %c0_44 = arith.constant 0 : index
    %c0_45 = arith.constant 0 : index
    %95 = vector.load %arg14[%c0_44, %c0_45] : memref<16x384xf32, #tpu.memory_space<vmem>>, vector<16x384xf32>
    tpu.vector_store %arg14[%c0_44, %c0_45], %94 {strides = array<i32>} : memref<16x384xf32, #tpu.memory_space<vmem>>, vector<16x384xf32>,
    return
  }
  func.func @transform_0(%arg0: i32) -> (i32, i32) {
    %c0_i32 = arith.constant 0 : i32
    %c0_i32_0 = arith.constant 0 : i32
    return %arg0, %c0_i32 : i32, i32
  }
  func.func @transform_1(%arg0: i32) -> (i32, i32) {
    %c0_i32 = arith.constant 0 : i32
    %c0_i32_0 = arith.constant 0 : i32
    %c0_i32_1 = arith.constant 0 : i32
    return %c0_i32, %c0_i32_0 : i32, i32
  }
  func.func @transform_2(%arg0: i32) -> (i32, i32) {
    %c0_i32 = arith.constant 0 : i32
    %c0_i32_0 = arith.constant 0 : i32
    %c0_i32_1 = arith.constant 0 : i32
    return %c0_i32, %c0_i32_0 : i32, i32
  }
  func.func @transform_3(%arg0: i32) -> (i32, i32) {
    %c0_i32 = arith.constant 0 : i32
    %c0_i32_0 = arith.constant 0 : i32
    %c0_i32_1 = arith.constant 0 : i32
    return %c0_i32, %c0_i32_0 : i32, i32
  }
  func.func @transform_4(%arg0: i32) -> (i32, i32) {
    %c0_i32 = arith.constant 0 : i32
    %c0_i32_0 = arith.constant 0 : i32
    %c0_i32_1 = arith.constant 0 : i32
    return %c0_i32, %c0_i32_0 : i32, i32
  }
  func.func @transform_5(%arg0: i32) -> (i32, i32) {
    %c0_i32 = arith.constant 0 : i32
    %c0_i32_0 = arith.constant 0 : i32
    %c0_i32_1 = arith.constant 0 : i32
    return %c0_i32, %c0_i32_0 : i32, i32
  }
  func.func @transform_6(%arg0: i32) -> (i32, i32) {
    %c0_i32 = arith.constant 0 : i32
    %c0_i32_0 = arith.constant 0 : i32
    %c0_i32_1 = arith.constant 0 : i32
    return %c0_i32, %c0_i32_0 : i32, i32
  }
  func.func @transform_7(%arg0: i32) -> (i32, i32) {
    %c0_i32 = arith.constant 0 : i32
    %c0_i32_0 = arith.constant 0 : i32
    %c0_i32_1 = arith.constant 0 : i32
    return %c0_i32, %c0_i32_0 : i32, i32
  }
  func.func @transform_8(%arg0: i32) -> (i32, i32) {
    %c0_i32 = arith.constant 0 : i32
    %c0_i32_0 = arith.constant 0 : i32
    %c0_i32_1 = arith.constant 0 : i32
    return %c0_i32, %c0_i32_0 : i32, i32
  }
  func.func @transform_9(%arg0: i32) -> (i32, i32) {
    %c0_i32 = arith.constant 0 : i32
    %c0_i32_0 = arith.constant 0 : i32
    %c0_i32_1 = arith.constant 0 : i32
    return %c0_i32, %c0_i32_0 : i32, i32
  }
  func.func @transform_10(%arg0: i32) -> (i32, i32) {
    %c0_i32 = arith.constant 0 : i32
    %c0_i32_0 = arith.constant 0 : i32
    %c0_i32_1 = arith.constant 0 : i32
    return %c0_i32, %c0_i32_0 : i32, i32
  }
  func.func @transform_11(%arg0: i32) -> (i32, i32) {
    %c0_i32 = arith.constant 0 : i32
    %c0_i32_0 = arith.constant 0 : i32
    %c0_i32_1 = arith.constant 0 : i32
    return %c0_i32, %c0_i32_0 : i32, i32
  }
  func.func @transform_12(%arg0: i32) -> (i32, i32) {
    %c0_i32 = arith.constant 0 : i32
    %c0_i32_0 = arith.constant 0 : i32
    %c0_i32_1 = arith.constant 0 : i32
    return %c0_i32, %c0_i32_0 : i32, i32
  }
  func.func @transform_13(%arg0: i32) -> (i32, i32) {
    %c0_i32 = arith.constant 0 : i32
    %c0_i32_0 = arith.constant 0 : i32
    return %arg0, %c0_i32 : i32, i32
  }
}

module attributes {stable_mosaic.version = 11 : i64} {
  func.func @kernel(%arg0: i32, %arg1: memref<16x384xf32, #tpu.memory_space<vmem>>, %arg2: memref<128x256xf32, #tpu.memory_space<vmem>>, %arg3: memref<1x256xf32, #tpu.memory_space<vmem>>, %arg4: memref<128x256xf32, #tpu.memory_space<vmem>>, %arg5: memref<1x256xf32, #tpu.memory_space<vmem>>, %arg6: memref<128x128xf32, #tpu.memory_space<vmem>>, %arg7: memref<1x128xf32, #tpu.memory_space<vmem>>, %arg8: memref<1x1xf32, #tpu.memory_space<vmem>>, %arg9: memref<1x128xf32, #tpu.memory_space<vmem>>, %arg10: memref<1x128xf32, #tpu.memory_space<vmem>>, %arg11: memref<1x1xf32, #tpu.memory_space<vmem>>, %arg12: memref<1x128xf32, #tpu.memory_space<vmem>>, %arg13: memref<1x128xf32, #tpu.memory_space<vmem>>, %arg14: memref<16x384xf32, #tpu.memory_space<vmem>>) attributes {dimension_semantics = [#tpu.dimension_semantics<parallel>], iteration_bounds = array<i64: 1>, scalar_prefetch = 0 : i64, scratch_operands = 0 : i64, tpu.core_type = #tpu.core_type<tc>, window_params = [{transform_indices = @transform_0, window_bounds = array<i64: 16, 384>}, {pipeline_mode = #tpu.pipeline_mode<synchronous>, transform_indices = @transform_1, window_bounds = array<i64: 128, 256>}, {pipeline_mode = #tpu.pipeline_mode<synchronous>, transform_indices = @transform_2, window_bounds = array<i64: 1, 256>}, {pipeline_mode = #tpu.pipeline_mode<synchronous>, transform_indices = @transform_3, window_bounds = array<i64: 128, 256>}, {pipeline_mode = #tpu.pipeline_mode<synchronous>, transform_indices = @transform_4, window_bounds = array<i64: 1, 256>}, {pipeline_mode = #tpu.pipeline_mode<synchronous>, transform_indices = @transform_5, window_bounds = array<i64: 128, 128>}, {pipeline_mode = #tpu.pipeline_mode<synchronous>, transform_indices = @transform_6, window_bounds = array<i64: 1, 128>}, {pipeline_mode = #tpu.pipeline_mode<synchronous>, transform_indices = @transform_7, window_bounds = array<i64: 1, 1>}, {pipeline_mode = #tpu.pipeline_mode<synchronous>, transform_indices = @transform_8, window_bounds = array<i64: 1, 128>}, {pipeline_mode = #tpu.pipeline_mode<synchronous>, transform_indices = @transform_9, window_bounds = array<i64: 1, 128>}, {pipeline_mode = #tpu.pipeline_mode<synchronous>, transform_indices = @transform_10, window_bounds = array<i64: 1, 1>}, {pipeline_mode = #tpu.pipeline_mode<synchronous>, transform_indices = @transform_11, window_bounds = array<i64: 1, 128>}, {pipeline_mode = #tpu.pipeline_mode<synchronous>, transform_indices = @transform_12, window_bounds = array<i64: 1, 128>}, {transform_indices = @transform_13, window_bounds = array<i64: 16, 384>}]} {
    %c0 = arith.constant 0 : index
    %c0_0 = arith.constant 0 : index
    %0 = vector.load %arg1[%c0, %c0_0] : memref<16x384xf32, #tpu.memory_space<vmem>>, vector<16x128xf32>
    %c0_1 = arith.constant 0 : index
    %c128 = arith.constant 128 : index
    %1 = vector.load %arg1[%c0_1, %c128] : memref<16x384xf32, #tpu.memory_space<vmem>>, vector<16x128xf32>
    %c0_2 = arith.constant 0 : index
    %c256 = arith.constant 256 : index
    %2 = vector.load %arg1[%c0_2, %c256] : memref<16x384xf32, #tpu.memory_space<vmem>>, vector<16x1xf32>
    %c0_3 = arith.constant 0 : index
    %c0_4 = arith.constant 0 : index
    %3 = vector.load %arg2[%c0_3, %c0_4] : memref<128x256xf32, #tpu.memory_space<vmem>>, vector<128x256xf32>
    %cst = arith.constant dense<0.000000e+00> : vector<16x256xf32>
    %4 = tpu.matmul %0, %3, %cst {dimension_numbers = #tpu.dot_dimension_numbers<[1], [0], [0], [1], [0, 0, 1, 1], [], []>} : vector<16x128xf32>, vector<128x256xf32>, vector<16x256xf32> -> vector<16x256xf32>
    %c0_5 = arith.constant 0 : index
    %c0_6 = arith.constant 0 : index
    %5 = vector.load %arg3[%c0_5, %c0_6] : memref<1x256xf32, #tpu.memory_space<vmem>>, vector<1x256xf32>
    %6 = vector.broadcast %5 : vector<1x256xf32> to vector<16x256xf32>
    %7 = arith.addf %4, %6 : vector<16x256xf32>
    %8 = vector.extract_strided_slice %7 {offsets = [0, 0], sizes = [16, 128], strides = [1, 1]} : vector<16x256xf32> to vector<16x128xf32>
    %9 = vector.extract_strided_slice %7 {offsets = [0, 128], sizes = [16, 128], strides = [1, 1]} : vector<16x256xf32> to vector<16x128xf32>
    %cst_7 = arith.constant dense<0xFF800000> : vector<16xf32>
    %10 = vector.multi_reduction <maximumf>, %8, %cst_7 [1] : vector<16x128xf32> to vector<16xf32>
    %11 = vector.shape_cast %10 : vector<16xf32> to vector<16x1xf32>
    %12 = vector.broadcast %11 : vector<16x1xf32> to vector<16x128xf32>
    %13 = arith.subf %8, %12 : vector<16x128xf32>
    %14 = math.exp %13 : vector<16x128xf32>
    %cst_8 = arith.constant dense<0.000000e+00> : vector<16xf32>
    %15 = vector.multi_reduction <add>, %14, %cst_8 [1] : vector<16x128xf32> to vector<16xf32>
    %16 = vector.shape_cast %15 : vector<16xf32> to vector<16x1xf32>
    %17 = tpu.reciprocal %16 : vector<16x1xf32> -> vector<16x1xf32>
    %18 = vector.broadcast %17 : vector<16x1xf32> to vector<16x128xf32>
    %19 = arith.mulf %14, %18 : vector<16x128xf32>
    %c0_9 = arith.constant 0 : index
    %c0_10 = arith.constant 0 : index
    %20 = vector.load %arg4[%c0_9, %c0_10] : memref<128x256xf32, #tpu.memory_space<vmem>>, vector<128x256xf32>
    %cst_11 = arith.constant dense<0.000000e+00> : vector<16x256xf32>
    %21 = tpu.matmul %19, %20, %cst_11 {dimension_numbers = #tpu.dot_dimension_numbers<[1], [0], [0], [1], [0, 0, 1, 1], [], []>} : vector<16x128xf32>, vector<128x256xf32>, vector<16x256xf32> -> vector<16x256xf32>
    %c0_12 = arith.constant 0 : index
    %c0_13 = arith.constant 0 : index
    %22 = vector.load %arg5[%c0_12, %c0_13] : memref<1x256xf32, #tpu.memory_space<vmem>>, vector<1x256xf32>
    %23 = vector.broadcast %22 : vector<1x256xf32> to vector<16x256xf32>
    %24 = arith.addf %21, %23 : vector<16x256xf32>
    %25 = vector.extract_strided_slice %24 {offsets = [0, 0], sizes = [16, 128], strides = [1, 1]} : vector<16x256xf32> to vector<16x128xf32>
    %cst_14 = arith.constant 0.000000e+00 : f32
    %26 = vector.broadcast %cst_14 : f32 to vector<16x128xf32>
    %27 = arith.maximumf %25, %26 : vector<16x128xf32>
    %28 = vector.extract_strided_slice %24 {offsets = [0, 128], sizes = [16, 128], strides = [1, 1]} : vector<16x256xf32> to vector<16x128xf32>
    %c0_15 = arith.constant 0 : index
    %c0_16 = arith.constant 0 : index
    %29 = vector.load %arg7[%c0_15, %c0_16] : memref<1x128xf32, #tpu.memory_space<vmem>>, vector<1x128xf32>
    %30 = vector.broadcast %29 : vector<1x128xf32> to vector<16x128xf32>
    %31 = arith.mulf %27, %30 : vector<16x128xf32>
    %cst_17 = arith.constant dense<0.000000e+00> : vector<16xf32>
    %32 = vector.multi_reduction <add>, %31, %cst_17 [1] : vector<16x128xf32> to vector<16xf32>
    %33 = vector.shape_cast %32 : vector<16xf32> to vector<16x1xf32>
    %c0_18 = arith.constant 0 : index
    %c0_19 = arith.constant 0 : index
    %34 = vector.load %arg8[%c0_18, %c0_19] : memref<1x1xf32, #tpu.memory_space<vmem>>, vector<1x1xf32>
    %35 = vector.broadcast %34 : vector<1x1xf32> to vector<16x1xf32>
    %36 = arith.addf %33, %35 : vector<16x1xf32>
    %cst_20 = arith.constant 5.000000e-01 : f32
    %37 = vector.broadcast %cst_20 : f32 to vector<16x1xf32>
    %38 = arith.mulf %37, %36 : vector<16x1xf32>
    %39 = math.tanh %38 : vector<16x1xf32>
    %cst_21 = arith.constant 1.000000e+00 : f32
    %40 = vector.broadcast %cst_21 : f32 to vector<16x1xf32>
    %41 = arith.addf %39, %40 : vector<16x1xf32>
    %cst_22 = arith.constant 5.000000e-01 : f32
    %42 = vector.broadcast %cst_22 : f32 to vector<16x1xf32>
    %43 = arith.mulf %42, %41 : vector<16x1xf32>
    %c0_23 = arith.constant 0 : index
    %c0_24 = arith.constant 0 : index
    %44 = vector.load %arg9[%c0_23, %c0_24] : memref<1x128xf32, #tpu.memory_space<vmem>>, vector<1x128xf32>
    %45 = vector.broadcast %43 : vector<16x1xf32> to vector<16x128xf32>
    %46 = vector.broadcast %44 : vector<1x128xf32> to vector<16x128xf32>
    %47 = arith.mulf %45, %46 : vector<16x128xf32>
    %48 = arith.addf %9, %47 : vector<16x128xf32>
    %c0_25 = arith.constant 0 : index
    %c0_26 = arith.constant 0 : index
    %49 = vector.load %arg6[%c0_25, %c0_26] : memref<128x128xf32, #tpu.memory_space<vmem>>, vector<128x128xf32>
    %cst_27 = arith.constant dense<0.000000e+00> : vector<16x128xf32>
    %50 = tpu.matmul %1, %49, %cst_27 {dimension_numbers = #tpu.dot_dimension_numbers<[1], [0], [0], [1], [0, 0, 1, 1], [], []>} : vector<16x128xf32>, vector<128x128xf32>, vector<16x128xf32> -> vector<16x128xf32>
    %51 = arith.addf %28, %50 : vector<16x128xf32>
    %cst_28 = arith.constant 0.000000e+00 : f32
    %52 = vector.broadcast %cst_28 : f32 to vector<16x128xf32>
    %53 = arith.maximumf %51, %52 : vector<16x128xf32>
    %c0_29 = arith.constant 0 : index
    %c0_30 = arith.constant 0 : index
    %54 = vector.load %arg10[%c0_29, %c0_30] : memref<1x128xf32, #tpu.memory_space<vmem>>, vector<1x128xf32>
    %55 = vector.broadcast %54 : vector<1x128xf32> to vector<16x128xf32>
    %56 = arith.mulf %53, %55 : vector<16x128xf32>
    %cst_31 = arith.constant dense<0.000000e+00> : vector<16xf32>
    %57 = vector.multi_reduction <add>, %56, %cst_31 [1] : vector<16x128xf32> to vector<16xf32>
    %58 = vector.shape_cast %57 : vector<16xf32> to vector<16x1xf32>
    %c0_32 = arith.constant 0 : index
    %c0_33 = arith.constant 0 : index
    %59 = vector.load %arg11[%c0_32, %c0_33] : memref<1x1xf32, #tpu.memory_space<vmem>>, vector<1x1xf32>
    %60 = vector.broadcast %59 : vector<1x1xf32> to vector<16x1xf32>
    %61 = arith.addf %58, %60 : vector<16x1xf32>
    %cst_34 = arith.constant 5.000000e-01 : f32
    %62 = vector.broadcast %cst_34 : f32 to vector<16x1xf32>
    %63 = arith.mulf %62, %61 : vector<16x1xf32>
    %64 = math.tanh %63 : vector<16x1xf32>
    %cst_35 = arith.constant 1.000000e+00 : f32
    %65 = vector.broadcast %cst_35 : f32 to vector<16x1xf32>
    %66 = arith.addf %64, %65 : vector<16x1xf32>
    %cst_36 = arith.constant 5.000000e-01 : f32
    %67 = vector.broadcast %cst_36 : f32 to vector<16x1xf32>
    %68 = arith.mulf %67, %66 : vector<16x1xf32>
    %cst_37 = arith.constant 0.899999976 : f32
    %69 = vector.broadcast %cst_37 : f32 to vector<16x1xf32>
    %70 = arith.mulf %69, %2 : vector<16x1xf32>
    %cst_38 = arith.constant 1.000000e-01 : f32
    %71 = vector.broadcast %cst_38 : f32 to vector<16x1xf32>
    %72 = arith.mulf %71, %68 : vector<16x1xf32>
    %73 = arith.addf %70, %72 : vector<16x1xf32>
    %c0_39 = arith.constant 0 : index
    %c0_40 = arith.constant 0 : index
    %74 = vector.load %arg12[%c0_39, %c0_40] : memref<1x128xf32, #tpu.memory_space<vmem>>, vector<1x128xf32>
    %75 = vector.broadcast %73 : vector<16x1xf32> to vector<16x128xf32>
    %76 = vector.broadcast %74 : vector<1x128xf32> to vector<16x128xf32>
    %77 = arith.mulf %75, %76 : vector<16x128xf32>
    %78 = arith.addf %48, %77 : vector<16x128xf32>
    %c0_41 = arith.constant 0 : index
    %c0_42 = arith.constant 0 : index
    %79 = vector.load %arg13[%c0_41, %c0_42] : memref<1x128xf32, #tpu.memory_space<vmem>>, vector<1x128xf32>
    %80 = vector.broadcast %79 : vector<1x128xf32> to vector<16x128xf32>
    %81 = arith.addf %78, %80 : vector<16x128xf32>
    %82 = tpu.iota {dimensions = array<i32: 1>} : vector<16x128xi32>
    %c0_i32 = arith.constant 0 : i32
    %83 = vector.broadcast %c0_i32 : i32 to vector<16x128xi32>
    %84 = arith.cmpi eq, %82, %83 : vector<16x128xi32>
    %c1_i32 = arith.constant 1 : i32
    %85 = vector.broadcast %c1_i32 : i32 to vector<16x128xi32>
    %86 = arith.cmpi eq, %82, %85 : vector<16x128xi32>
    %cst_43 = arith.constant 0.000000e+00 : f32
    %87 = vector.shape_cast %68 : vector<16x1xf32> to vector<16x1xf32>
    %88 = vector.broadcast %87 : vector<16x1xf32> to vector<16x128xf32>
    %89 = vector.broadcast %cst_43 : f32 to vector<16x128xf32>
    %90 = arith.select %86, %88, %89 : vector<16x128xi1>, vector<16x128xf32>
    %91 = vector.shape_cast %73 : vector<16x1xf32> to vector<16x1xf32>
    %92 = vector.broadcast %91 : vector<16x1xf32> to vector<16x128xf32>
    %93 = arith.select %84, %92, %90 : vector<16x128xi1>, vector<16x128xf32>
    %94 = tpu.concatenate %81, %19, %93 in 1 : vector<16x128xf32>, vector<16x128xf32>, vector<16x128xf32> -> vector<16x384xf32>
    %c0_44 = arith.constant 0 : index
    %c0_45 = arith.constant 0 : index
    %95 = vector.load %arg14[%c0_44, %c0_45] : memref<16x384xf32, #tpu.memory_space<vmem>>, vector<16x384xf32>
    tpu.vector_store %arg14[%c0_44, %c0_45], %94 {strides = array<i32>} : memref<16x384xf32, #tpu.memory_space<vmem>>, vector<16x384xf32>,
    return
  }
  func.func @transform_0(%arg0: i32) -> (i32, i32) {
    %c0_i32 = arith.constant 0 : i32
    %c0_i32_0 = arith.constant 0 : i32
    return %arg0, %c0_i32 : i32, i32
  }
  func.func @transform_1(%arg0: i32) -> (i32, i32) {
    %c0_i32 = arith.constant 0 : i32
    %c0_i32_0 = arith.constant 0 : i32
    %c0_i32_1 = arith.constant 0 : i32
    return %c0_i32, %c0_i32_0 : i32, i32
  }
  func.func @transform_2(%arg0: i32) -> (i32, i32) {
    %c0_i32 = arith.constant 0 : i32
    %c0_i32_0 = arith.constant 0 : i32
    %c0_i32_1 = arith.constant 0 : i32
    return %c0_i32, %c0_i32_0 : i32, i32
  }
  func.func @transform_3(%arg0: i32) -> (i32, i32) {
    %c0_i32 = arith.constant 0 : i32
    %c0_i32_0 = arith.constant 0 : i32
    %c0_i32_1 = arith.constant 0 : i32
    return %c0_i32, %c0_i32_0 : i32, i32
  }
  func.func @transform_4(%arg0: i32) -> (i32, i32) {
    %c0_i32 = arith.constant 0 : i32
    %c0_i32_0 = arith.constant 0 : i32
    %c0_i32_1 = arith.constant 0 : i32
    return %c0_i32, %c0_i32_0 : i32, i32
  }
  func.func @transform_5(%arg0: i32) -> (i32, i32) {
    %c0_i32 = arith.constant 0 : i32
    %c0_i32_0 = arith.constant 0 : i32
    %c0_i32_1 = arith.constant 0 : i32
    return %c0_i32, %c0_i32_0 : i32, i32
  }
  func.func @transform_6(%arg0: i32) -> (i32, i32) {
    %c0_i32 = arith.constant 0 : i32
    %c0_i32_0 = arith.constant 0 : i32
    %c0_i32_1 = arith.constant 0 : i32
    return %c0_i32, %c0_i32_0 : i32, i32
  }
  func.func @transform_7(%arg0: i32) -> (i32, i32) {
    %c0_i32 = arith.constant 0 : i32
    %c0_i32_0 = arith.constant 0 : i32
    %c0_i32_1 = arith.constant 0 : i32
    return %c0_i32, %c0_i32_0 : i32, i32
  }
  func.func @transform_8(%arg0: i32) -> (i32, i32) {
    %c0_i32 = arith.constant 0 : i32
    %c0_i32_0 = arith.constant 0 : i32
    %c0_i32_1 = arith.constant 0 : i32
    return %c0_i32, %c0_i32_0 : i32, i32
  }
  func.func @transform_9(%arg0: i32) -> (i32, i32) {
    %c0_i32 = arith.constant 0 : i32
    %c0_i32_0 = arith.constant 0 : i32
    %c0_i32_1 = arith.constant 0 : i32
    return %c0_i32, %c0_i32_0 : i32, i32
  }
  func.func @transform_10(%arg0: i32) -> (i32, i32) {
    %c0_i32 = arith.constant 0 : i32
    %c0_i32_0 = arith.constant 0 : i32
    %c0_i32_1 = arith.constant 0 : i32
    return %c0_i32, %c0_i32_0 : i32, i32
  }
  func.func @transform_11(%arg0: i32) -> (i32, i32) {
    %c0_i32 = arith.constant 0 : i32
    %c0_i32_0 = arith.constant 0 : i32
    %c0_i32_1 = arith.constant 0 : i32
    return %c0_i32, %c0_i32_0 : i32, i32
  }
  func.func @transform_12(%arg0: i32) -> (i32, i32) {
    %c0_i32 = arith.constant 0 : i32
    %c0_i32_0 = arith.constant 0 : i32
    %c0_i32_1 = arith.constant 0 : i32
    return %c0_i32, %c0_i32_0 : i32, i32
  }
  func.func @transform_13(%arg0: i32) -> (i32, i32) {
    %c0_i32 = arith.constant 0 : i32
    %c0_i32_0 = arith.constant 0 : i32
    return %arg0, %c0_i32 : i32, i32
  }
}

</mosaic_0001>

<bundles_post_ra>
// kernel: tpu_custom_call.1
= control target key start
LH: loop header
LB: loop body
LE: loop exit
PB: predicated region body
PF: predicated region fallthrough
CT: control target
= control target key end

     0   :  { %s866_s0 = inlined_call_operand.hbm [shape: f32[16,384], index: 0, kind: input, shape index: {}]   ;;  %s867_s1 = inlined_call_operand.hbm [shape: f32[128,256], index: 1, kind: input, shape index: {}]   ;;  %s868_s2 = inlined_call_operand.vmem [shape: f32[1,256], index: 2, kind: input, shape index: {}]   ;;  %s869_s3 = inlined_call_operand.hbm [shape: f32[128,256], index: 3, kind: input, shape index: {}]   ;;  %s870_s4 = inlined_call_operand.vmem [shape: f32[1,256], index: 4, kind: input, shape index: {}]   ;;  %s871_s5 = inlined_call_operand.hbm [shape: f32[128,128], index: 5, kind: input, shape index: {}]   ;;  %s872_s6 = inlined_call_operand.vmem [shape: f32[1,128], index: 6, kind: input, shape index: {}]   ;;  %s873_s7 = inlined_call_operand.<no memory space> [shape: f32[1,1], index: 7, kind: input, shape index: {}]   ;;  %s874_s8 = inlined_call_operand.vmem [shape: f32[1,128], index: 8, kind: input, shape index: {}]   ;;  %s875_s9 = inlined_call_operand.vmem [shape: f32[1,128], index: 9, kind: input, shape index: {}]   ;;  %s876_s11 = inlined_call_operand.vmem [shape: f32[1,128], index: 11, kind: input, shape index: {}]   ;;  %s877_s12 = inlined_call_operand.vmem [shape: f32[1,128], index: 12, kind: input, shape index: {}]   ;;  %s878_s13 = inlined_call_operand.hbm [shape: f32[16,384], index: 13, kind: output, shape index: {}]   ;;  %s879_s10 = inlined_call_operand.<no memory space> [shape: f32[1,1], index: 10, kind: input, shape index: {}]  }
   0x1   :  { %v18_v0 = vstv %s873_s7  ;;  %v20_v1 = vstv %s879_s10 }
   0x2   :  { %19 = vst [vmem:[#allocation2] sm:$0x1] %v18_v0 }
   0x3   :  { %21 = vst [vmem:[#allocation3] sm:$0x1] %v20_v1 }
   0x4   :  { %22 = vsyncpa [#allocation5], 0 }
   0x5   :  { %23 = vsyncpa [#allocation8], 0 }
   0x6   :  { %24 = vsyncpa [#allocation11], 0  ;;  %s43_s14 = sshll.u32 %s867_s1, 4  ;;  %s44_s14 = int_to_ptr.hbm [resolvable:$true] %s43_s14 }
   0x7   :  { %25 = vsyncpa [#allocation6], 0  ;;  %s698_s15 = smov [#allocation7]   ;;  %s30_s18 = sshll.u32 %s866_s0, 4  ;;  %s31_s18 = int_to_ptr.hbm [resolvable:$true] %s30_s18 }
   0x8   :  { %s45_s16 = sshll.u32 %s698_s15, 4  ;;  %s699_s19 = smov 256   ;;  %s46_s16 = int_to_ptr.vmem [resolvable:$true] %s45_s16 }
   0x9   :  { %s700_s10 = smov 16   ;;  %s701_s20 = smov [#allocation4]  }
   0xa   :  { %51 = dma.hbm_to_vmem [thread:$0]  %s44_s14, 4096, %s46_s16, [#allocation8], %s699_s19, %s699_s19, %s700_s10  }
   0xb   :  { %s32_s21 = sshll.u32 %s701_s20, 4  ;;  %s702_s22 = smov 384   ;;  %s33_s21 = int_to_ptr.vmem [resolvable:$true] %s32_s21 }
   0xc   :  { %s703_s23 = smov 24   ;;  %s58_s25 = sshll.u32 %s869_s3, 4  ;;  %s59_s25 = int_to_ptr.hbm [resolvable:$true] %s58_s25 }
   0xd   :  { %38 = dma.hbm_to_vmem [thread:$0]  %s31_s18, 768, %s33_s21, [#allocation5], %s702_s22, %s702_s22, %s703_s23  }
   0xe   :  { %s704_s26 = smov [#allocation9]   ;;  %s73_s29 = sshll.u32 %s871_s5, 4  ;;  %s74_s29 = int_to_ptr.hbm [resolvable:$true] %s73_s29 }
   0xf   :  { %s60_s0 = sshll.u32 %s704_s26, 4  ;;  %s705_s30 = smov [#allocation10]   ;;  %s61_s0 = int_to_ptr.vmem [resolvable:$true] %s60_s0 }
  0x10   :  { %66 = dma.hbm_to_vmem [thread:$0]  %s59_s25, 4096, %s61_s0, [#allocation8], %s699_s19, %s699_s19, %s700_s10  }
  0x11   :  { %s75_s14 = sshll.u32 %s705_s30, 4  ;;  %s706_s15 = smov 128   ;;  %s76_s14 = int_to_ptr.vmem [resolvable:$true] %s75_s14 }
  0x12   :  { %s707_s16 = smov 8  }
  0x13   :  { %81 = dma.hbm_to_vmem [thread:$0]  %s74_s29, 2048, %s76_s14, [#allocation11], %s706_s15, %s706_s15, %s707_s16  }
  0x14   :  { %690 = dma.done.wait [#allocation5], 768  }
  0x15   :  { %691 = vsyncadd [#allocation5], 4294966528 }
  0x16   :  { %692 = dma.done.wait [#allocation8], 8192  }
  0x17   :  { %693 = vsyncadd [#allocation8], 4294959104 }
  0x18   :  { %694 = dma.done.wait [#allocation11], 2048  }
  0x19   :  { %695 = vsyncadd [#allocation11], 4294965248  ;;  %v148_v2 = vld [vmem:[#allocation7 + $0xf0] sm:$0xff]  ;;  %v146_v3 = vld [vmem:[#allocation7 + $0xe0] sm:$0xff] }
  0x1a   :  { %156 = vmatpush.msra.mxu0 %v148_v2  ;;  %v144_v4 = vld [vmem:[#allocation7 + $0xd0] sm:$0xff]  ;;  %v142_v5 = vld [vmem:[#allocation7 + $0xc0] sm:$0xff]  ;;  %v804_v19 = vld [vmem:[#allocation4 + $0x18] sm:$0xff] }
  0x1b   :  { %v140_v6 = vld [vmem:[#allocation7 + $0xb0] sm:$0xff]  ;;  %v138_v7 = vld [vmem:[#allocation7 + $0xa0] sm:$0xff]  ;;  %v810_v20 = vld [vmem:[%s868_s2] sm:$0x3] }
  0x1c   :  { %157 = vmatpush.msra.mxu0 %v146_v3  ;;  %v136_v8 = vld [vmem:[#allocation7 + $0x90] sm:$0xff]  ;;  %v134_v9 = vld [vmem:[#allocation7 + $0x80] sm:$0xff]  ;;  %v152_v21 = vperm.slane %v810_v20, 0  ;;  %v149_v26 = vld [vmem:[#allocation7 + $0xf8] sm:$0xff] }
  0x1d   :  { %v132_v10 = vld [vmem:[#allocation7 + $0x70] sm:$0xff]  ;;  %v130_v11 = vld [vmem:[#allocation7 + $0x60] sm:$0xff]  ;;  %v147_v27 = vld [vmem:[#allocation7 + $0xe8] sm:$0xff]  ;;  %179 = vmatpush.msra.mxu1 %v149_v26 }
  0x1e   :  { %158 = vmatpush.msra.mxu0 %v144_v4  ;;  %v128_v12 = vld [vmem:[#allocation7 + $0x50] sm:$0xff]  ;;  %v126_v13 = vld [vmem:[#allocation7 + $0x40] sm:$0xff]  ;;  %v145_v28 = vld [vmem:[#allocation7 + $0xd8] sm:$0xff] }
  0x1f   :  { %v124_v14 = vld [vmem:[#allocation7 + $0x30] sm:$0xff]  ;;  %v122_v15 = vld [vmem:[#allocation7 + $0x20] sm:$0xff]  ;;  %180 = vmatpush.msra.mxu1 %v147_v27  ;;  %v277_v30 = vld [vmem:[#allocation9 + $0xf8] sm:$0xff] }
  0x20   :  { %159 = vmatpush.msra.mxu0 %v142_v5  ;;  %v120_v16 = vld [vmem:[#allocation7 + $0x10] sm:$0xff]  ;;  %v118_v17 = vld [vmem:[#allocation7] sm:$0xff]  ;;  %v143_v32 = vld [vmem:[#allocation7 + $0xc8] sm:$0xff]  ;;  %307 = vmatpush.msra.mxu3 %v277_v30 }
  0x21   :  { %v801_v18 = vld [vmem:[#allocation4] sm:$0xff]  ;;  %v274_v31 = vld [vmem:[#allocation9 + $0xe0] sm:$0xff]  ;;  %v275_v33 = vld [vmem:[#allocation9 + $0xe8] sm:$0xff]  ;;  %181 = vmatpush.msra.mxu1 %v145_v28 }
  0x22   :  { %160 = vmatpush.msra.mxu0 %v140_v6  ;;  %v276_v29 = vld [vmem:[#allocation9 + $0xf0] sm:$0xff]  ;;  %v273_v35 = vld [vmem:[#allocation9 + $0xd8] sm:$0xff]  ;;  %308 = vmatpush.msra.mxu3 %v275_v33  ;;  %v270_v37 = vld [vmem:[#allocation9 + $0xc0] sm:$0xff] }
  0x23   :  { %284 = vmatpush.msra.mxu2 %v276_v29  ;;  %v272_v34 = vld [vmem:[#allocation9 + $0xd0] sm:$0xff]  ;;  %v141_v36 = vld [vmem:[#allocation7 + $0xb8] sm:$0xff]  ;;  %182 = vmatpush.msra.mxu1 %v143_v32  ;;  %v271_v38 = vld [vmem:[#allocation9 + $0xc8] sm:$0xff] }
  0x24   :  { %161 = vmatpush.msra.mxu0 %v138_v7  ;;  %v813_v39 = vld [vmem:[#allocation10 + $0x78] sm:$0xff]  ;;  %v139_v40 = vld [vmem:[#allocation7 + $0xa8] sm:$0xff]  ;;  %309 = vmatpush.msra.mxu3 %v273_v35  ;;  %v268_v41 = vld [vmem:[#allocation9 + $0xb0] sm:$0xff] }
  0x25   :  { %285 = vmatpush.msra.mxu2 %v274_v31  ;;  %v816_v42 = vld [vmem:[#allocation10 + $0x70] sm:$0xff]  ;;  %183 = vmatpush.msra.mxu1 %v141_v36  ;;  %v269_v43 = vld [vmem:[#allocation9 + $0xb8] sm:$0xff]  ;;  %v266_v45 = vld [vmem:[#allocation9 + $0xa0] sm:$0xff] }
  0x26   :  { %162 = vmatpush.msra.mxu0 %v136_v8  ;;  %v137_v44 = vld [vmem:[#allocation7 + $0x98] sm:$0xff]  ;;  %310 = vmatpush.msra.mxu3 %v271_v38  ;;  %v267_v46 = vld [vmem:[#allocation9 + $0xa8] sm:$0xff]  ;;  %v264_v62 = vld [vmem:[#allocation9 + $0x90] sm:$0xff] }
  0x27   :  { %286 = vmatpush.msra.mxu2 %v272_v34  ;;  %184 = vmatpush.msra.mxu1 %v139_v40  ;;  %v135_v48 = vld [vmem:[#allocation7 + $0x88] sm:$0xff]  ;;  %v133_v50 = vld [vmem:[#allocation7 + $0x78] sm:$0xff]  ;;  %v262_v2 = vld [vmem:[#allocation9 + $0x80] sm:$0xff] }
  0x28   :  { %163 = vmatpush.msra.mxu0 %v134_v9  ;;  %311 = vmatpush.msra.mxu3 %v269_v43  ;;  %v131_v52 = vld [vmem:[#allocation7 + $0x68] sm:$0xff]  ;;  %v129_v53 = vld [vmem:[#allocation7 + $0x58] sm:$0xff]  ;;  %v386_v4 = vld [vmem:[#allocation10 + $0x60] sm:$0xff] }
  0x29   :  { %287 = vmatpush.msra.mxu2 %v270_v37  ;;  %185 = vmatpush.msra.mxu1 %v137_v44  ;;  %v127_v55 = vld [vmem:[#allocation7 + $0x48] sm:$0xff]  ;;  %v125_v57 = vld [vmem:[#allocation7 + $0x38] sm:$0xff]  ;;  %v260_v6 = vld [vmem:[#allocation9 + $0x70] sm:$0xff] }
  0x2a   :  { %164 = vmatpush.msra.mxu0 %v132_v10  ;;  %312 = vmatpush.msra.mxu3 %v267_v46  ;;  %v123_v60 = vld [vmem:[#allocation7 + $0x28] sm:$0xff]  ;;  %v265_v63 = vld [vmem:[#allocation9 + $0x98] sm:$0xff]  ;;  %v258_v9 = vld [vmem:[#allocation9 + $0x60] sm:$0xff] }
  0x2b   :  { %288 = vmatpush.msra.mxu2 %v268_v41  ;;  %186 = vmatpush.msra.mxu1 %v135_v48  ;;  %v387_v0 = vld [vmem:[#allocation10 + $0x68] sm:$0xff]  ;;  %v121_v1 = vld [vmem:[#allocation7 + $0x18] sm:$0xff]  ;;  %v380_v26 = vld [vmem:[#allocation10 + $0x30] sm:$0xff] }
  0x2c   :  { %165 = vmatpush.msra.mxu0 %v130_v11  ;;  %313 = vmatpush.msra.mxu3 %v265_v63  ;;  %v263_v3 = vld [vmem:[#allocation9 + $0x88] sm:$0xff]  ;;  %v261_v7 = vld [vmem:[#allocation9 + $0x78] sm:$0xff]  ;;  %v384_v11 = vld [vmem:[#allocation10 + $0x50] sm:$0xff] }
  0x2d   :  { %289 = vmatpush.msra.mxu2 %v266_v45  ;;  %187 = vmatpush.msra.mxu1 %v133_v50  ;;  %v119_v5 = vld [vmem:[#allocation7 + $0x8] sm:$0xff]  ;;  %v385_v8 = vld [vmem:[#allocation10 + $0x58] sm:$0xff]  ;;  %v248_v27 = vld [vmem:[#allocation9 + $0x10] sm:$0xff] }
  0x2e   :  { %166 = vmatpush.msra.mxu0 %v128_v12  ;;  %314 = vmatpush.msra.mxu3 %v263_v3  ;;  %v259_v10 = vld [vmem:[#allocation9 + $0x68] sm:$0xff]  ;;  %v256_v12 = vld [vmem:[#allocation9 + $0x50] sm:$0xff]  ;;  %v249_v28 = vld [vmem:[#allocation9 + $0x18] sm:$0xff] }
  0x2f   :  { %188 = vmatpush.msra.mxu1 %v131_v52  ;;  %290 = vmatpush.msra.mxu2 %v264_v62  ;;  %v379_v29 = vld [vmem:[#allocation10 + $0x28] sm:$0xff]  ;;  %v246_v30 = vld [vmem:[#allocation9] sm:$0xff]  ;;  %v377_v33 = vld [vmem:[#allocation10 + $0x18] sm:$0xff] }
  0x30   :  { %167 = vmatpush.msra.mxu0 %v126_v13  ;;  %315 = vmatpush.msra.mxu3 %v261_v7  ;;  %v257_v13 = vld [vmem:[#allocation9 + $0x58] sm:$0xff]  ;;  %v247_v31 = vld [vmem:[#allocation9 + $0x8] sm:$0xff]  ;;  %v378_v32 = vld [vmem:[#allocation10 + $0x20] sm:$0xff] }
  0x31   :  { %189 = vmatpush.msra.mxu1 %v129_v53  ;;  %291 = vmatpush.msra.mxu2 %v262_v2  ;;  %v376_v34 = vld [vmem:[#allocation10 + $0x10] sm:$0xff]  ;;  %v375_v35 = vld [vmem:[#allocation10 + $0x8] sm:$0xff]  ;;  %v374_v36 = vld [vmem:[#allocation10] sm:$0xff] }
  0x32   :  { %168 = vmatpush.msra.mxu0 %v124_v14  ;;  %316 = vmatpush.msra.mxu3 %v259_v10  ;;  %v383_v14 = vld [vmem:[#allocation10 + $0x48] sm:$0xff]  ;;  %v114_v37 = vld [vmem:[#allocation4 + $0x8] sm:$0xff] }
  0x33   :  { %190 = vmatpush.msra.mxu1 %v127_v55  ;;  %292 = vmatpush.msra.mxu2 %v260_v6  ;;  %v278_v63 = vld [vmem:[%s870_s4] sm:$0x3] }
  0x34   :  { %169 = vmatpush.msra.mxu0 %v122_v15  ;;  %317 = vmatpush.msra.mxu3 %v257_v13  ;;  %v254_v15 = vld [vmem:[#allocation9 + $0x40] sm:$0xff]  ;;  %v548_v10 = vld [vmem:[%s875_s9] ss:$0 sm:$0xff] }
  0x35   :  { %191 = vmatpush.msra.mxu1 %v125_v57  ;;  %293 = vmatpush.msra.mxu2 %v258_v9 }
  0x36   :  { %170 = vmatpush.msra.mxu0 %v120_v16  ;;  %v255_v16 = vld [vmem:[#allocation9 + $0x48] sm:$0xff] }
  0x37   :  { %192 = vmatpush.msra.mxu1 %v123_v60  ;;  %294 = vmatpush.msra.mxu2 %v256_v12 }
  0x38   :  { %171 = vmatpush.msra.mxu0 %v118_v17  ;;  %v382_v17 = vld [vmem:[#allocation10 + $0x40] sm:$0xff]  ;;  %318 = vmatpush.msra.mxu3 %v255_v16 }
  0x39   :  { %172 = vmatmul.f32.vlgmr.msra.gmra.mxu0 %v801_v18  ;;  %193 = vmatpush.msra.mxu1 %v121_v1  ;;  %v281_v1 = vperm.slane %v278_v63, 1 }
  0x3a   :  { %390 = vmatpush.msrb.mxu0 %v813_v39  ;;  %295 = vmatpush.msra.mxu2 %v254_v15 }
  0x3b   :  { %194 = vmatpush.msra.mxu1 %v119_v5 }
  0x3c   :  { %391 = vmatpush.msrb.mxu0 %v816_v42  ;;  %195 = vmatmul.f32.vlgmr.msra.gmra.mxu1 %v801_v18  ;;  %v115_v18 = vld [vmem:[#allocation4 + $0x20] sm:$0xff] }
  0x3d   :  { %516 = vmatpush.msrb.mxu1 %v813_v39 }
  0x3e   :  { %392 = vmatpush.msrb.mxu0 %v387_v0 }
  0x3f   :  { %517 = vmatpush.msrb.mxu1 %v816_v42 }
  0x40   :  { %393 = vmatpush.msrb.mxu0 %v386_v4 }
  0x41   :  { %175 = vmatmul.f32.gmra.mxu0 %v804_v19  ;;  %518 = vmatpush.msrb.mxu1 %v387_v0  ;;  %v280_v0 = vperm.slane %v278_v63, 0 }
  0x42   :  { %394 = vmatpush.msrb.mxu0 %v385_v8 }
  0x43   :  { %519 = vmatpush.msrb.mxu1 %v386_v4 }
  0x44   :  { %395 = vmatpush.msrb.mxu0 %v384_v11  ;;  %198 = vmatmul.f32.gmra.mxu1 %v804_v19 }
  0x45   :  { %520 = vmatpush.msrb.mxu1 %v385_v8 }
  0x46   :  { %396 = vmatpush.msrb.mxu0 %v383_v14 }
  0x47   :  { %521 = vmatpush.msrb.mxu1 %v384_v11 }
  0x48   :  { %397 = vmatpush.msrb.mxu0 %v382_v17 }
  0x49   :  { %522 = vmatpush.msrb.mxu1 %v383_v14 }
  0x4b   :  { %523 = vmatpush.msrb.mxu1 %v382_v17 }
  0xb6   :  { %v173_v22 = vpop.f32.mrf.mxu0 }
  0xb7   :  { %v174_v23 = vadd.f32 %v173_v22, %v152_v21  ;;  %v253_v22 = vld [vmem:[#allocation9 + $0x38] sm:$0xff] }
  0xb8   :  { %319 = vmatpush.msra.mxu3 %v253_v22 }
  0xb9   :  { %202 = vmax.xlane.f32.xlu0 %v174_v23 }
  0xbe   :  { %v176_v24 = vpop.f32.mrf.mxu0 }
  0xbf   :  { %v177_v25 = vadd.f32 %v176_v24, %v152_v21  ;;  %v252_v21 = vld [vmem:[#allocation9 + $0x30] sm:$0xff]  ;;  %v250_v24 = vld [vmem:[#allocation9 + $0x20] sm:$0xff] }
  0xc0   :  { %296 = vmatpush.msra.mxu2 %v252_v21 }
  0xc1   :  { %204 = vmax.xlane.f32.xlu0 %v177_v25 }
  0xc2   :  { %297 = vmatpush.msra.mxu2 %v250_v24 }
  0xc4   :  { %298 = vmatpush.msra.mxu2 %v248_v27  ;;  %v708_v27 = vmov 0  }
  0xc5   :  { %544 = vset.pattern.permute.xlu2 %v708_v27  ;;  %546 = vset.pattern.permute.xlu1 %v708_v27 }
  0xc6   :  { %299 = vmatpush.msra.mxu2 %v246_v30  ;;  %545 = vset.pattern.permute.xlu0 %v708_v27 }
 0x12c   :  { %v203_v47 = vpop.xlane.xlu0 %202 }
 0x12d   :  { %v206_v49 = vsub.f32 %v174_v23, %v203_v47  ;;  %v381_v23 = vld [vmem:[#allocation10 + $0x38] sm:$0xff] }
 0x12e   :  { %398 = vmatpush.msrb.mxu0 %v381_v23  ;;  %524 = vmatpush.msrb.mxu1 %v381_v23 }
 0x12f   :  { %v208_v51 = vmul.f32 1.442695, %v206_v49 }
 0x130   :  { %399 = vmatpush.msrb.mxu0 %v380_v26  ;;  %525 = vmatpush.msrb.mxu1 %v380_v26 }
 0x131   :  { %554 = vpow2.f32 %v208_v51 }
 0x132   :  { %400 = vmatpush.msrb.mxu0 %v379_v29  ;;  %526 = vmatpush.msrb.mxu1 %v379_v29  ;;  %v550_v29 = vld [vmem:[#allocation3] ss:$0 sm:$0xff] }
 0x134   :  { %v205_v54 = vpop.xlane.xlu0 %204  ;;  %401 = vmatpush.msrb.mxu0 %v378_v32  ;;  %527 = vmatpush.msrb.mxu1 %v378_v32 }
 0x135   :  { %v207_v56 = vsub.f32 %v177_v25, %v205_v54  ;;  %v251_v25 = vld [vmem:[#allocation9 + $0x28] sm:$0xff] }
 0x136   :  { %320 = vmatpush.msra.mxu3 %v251_v25  ;;  %402 = vmatpush.msrb.mxu0 %v377_v33 }
 0x137   :  { %v819_v58 = vpop.eup %554  ;;  %v210_v59 = vmul.f32 1.442695, %v207_v56  ;;  %528 = vmatpush.msrb.mxu1 %v377_v33 }
 0x138   :  { %212 = vadd.xlane.f32.xlu1 %v819_v58  ;;  %321 = vmatpush.msra.mxu3 %v249_v28  ;;  %v549_v28 = vld [vmem:[#allocation2] ss:$0 sm:$0xff] }
 0x139   :  { %556 = vpow2.f32 %v210_v59  ;;  %403 = vmatpush.msrb.mxu0 %v376_v34  ;;  %529 = vmatpush.msrb.mxu1 %v376_v34 }
 0x13a   :  { %322 = vmatpush.msra.mxu3 %v247_v31 }
 0x13b   :  { %404 = vmatpush.msrb.mxu0 %v375_v35  ;;  %530 = vmatpush.msrb.mxu1 %v375_v35 }
 0x13d   :  { %405 = vmatpush.msrb.mxu0 %v374_v36  ;;  %531 = vmatpush.msrb.mxu1 %v374_v36 }
 0x13e   :  { %406 = vmatmul.f32.vlgmr.msrb.gmra.mxu0 %v114_v37  ;;  %409 = vmatmul.f32.vlgmr.msrb.gmra.mxu1 %v115_v18 }
 0x13f   :  { %v822_v61 = vpop.eup %556 }
 0x140   :  { %214 = vadd.xlane.f32.xlu1 %v822_v61 }
 0x1ab   :  { %v213_v38 = vpop.xlane.xlu1 %212 }
 0x1ac   :  { %558 = vrcp.f32 %v213_v38  ;;  %v227_v43 = vand.u32 2147483648, %v213_v38  ;;  %v225_v45 = vand.u32 2147483647, %v213_v38  ;;  %vm221_vm1 = vweird.f32 %v213_v38 }
 0x1ae   :  { %v228_v47 = vor.u32 1.1754944e-38, %v227_v43  ;;  %vm226_vm3 = vcmp.eq.f32.partialorder %v225_v45, 8.507059e+37 }
 0x1b2   :  { %v559_v39 = vpop.eup %558 }
 0x1b3   :  { %v217_v40 = vmul.f32 %v559_v39, %v213_v38  ;;  %v215_v41 = vpop.xlane.xlu1 %214  ;;  %vm222_vm0 = vweird.f32 %v559_v39 }
 0x1b4   :  { %560 = vrcp.f32 %v215_v41  ;;  %vm223_vm2 = vmor %vm221_vm1, %vm222_vm0  ;;  %v241_v53 = vand.u32 2147483648, %v215_v41  ;;  %v239_v55 = vand.u32 2147483647, %v215_v41  ;;  %vm235_vm5 = vweird.f32 %v215_v41 }
 0x1b5   :  { %v218_v42 = vsub.f32 1.0, %v217_v40 }
 0x1b6   :  { %v242_v57 = vor.u32 1.1754944e-38, %v241_v53  ;;  %vm240_vm7 = vcmp.eq.f32.partialorder %v239_v55, 8.507059e+37  ;;  %v117_v53 = vld [vmem:[#allocation4 + $0x28] sm:$0xff] }
 0x1b7   :  { %v219_v44 = vmul.f32 %v559_v39, %v218_v42 }
 0x1b9   :  { %v220_v19 = vadd.f32 %v559_v39, %v219_v44  ;;  %v116_v44 = vld [vmem:[#allocation4 + $0x10] sm:$0xff] }
 0x1ba   :  { %v561_v46 = vpop.eup %560 }
 0x1bb   :  { %v231_v48 = vmul.f32 %v561_v46, %v215_v41  ;;  %v224_v49 = vsel %vm223_vm2, %v559_v39, %v220_v19  ;;  %vm236_vm4 = vweird.f32 %v561_v46  ;;  %v407_v3 = vpop.f32.mrf.mxu0 }
 0x1bc   :  { %v229_v50 = vsel %vm226_vm3, %v228_v47, %v224_v49  ;;  %vm237_vm6 = vmor %vm235_vm5, %vm236_vm4  ;;  %v441_v47 = vmul.f32 0.9, %v116_v44 }
 0x1bd   :  { %v232_v51 = vsub.f32 1.0, %v231_v48  ;;  %v244_v52 = vmul.f32 %v819_v58, %v229_v50  ;;  %v831_v58 = vpop.f32.mrf.mxu1 }
 0x1bf   :  { %v233_v54 = vmul.f32 %v561_v46, %v232_v51  ;;  %300 = vmatmul.f32.vlgmr.msra.gmra.mxu2 %v244_v52  ;;  %490 = vst [vmem:[#allocation12 + $0x8] sm:$0xff] %v244_v52  ;;  %323 = vmatmul.f32.vlgmr.msra.gmra.mxu3 %v244_v52 }
 0x1c1   :  { %v234_v56 = vadd.f32 %v561_v46, %v233_v54 }
 0x1c3   :  { %v238_v59 = vsel %vm237_vm6, %v561_v46, %v234_v56 }
 0x1c4   :  { %v243_v60 = vsel %vm240_vm7, %v242_v57, %v238_v59  ;;  %v442_v57 = vmul.f32 0.9, %v117_v53 }
 0x1c5   :  { %v245_v62 = vmul.f32 %v822_v61, %v243_v60  ;;  %v836_v2 = vpop.f32.mrf.mxu1  ;;  %v547_v61 = vld [vmem:[%s872_s6] ss:$0 sm:$0xff] }
 0x1c7   :  { %303 = vmatmul.f32.gmra.mxu2 %v245_v62  ;;  %493 = vst [vmem:[#allocation12 + $0x20] sm:$0xff] %v245_v62  ;;  %326 = vmatmul.f32.gmra.mxu3 %v245_v62 }
 0x1cd   :  { %v410_v14 = vpop.f32.mrf.mxu1 }
 0x242   :  { %v301_v4 = vpop.f32.mrf.mxu2  ;;  %v324_v5 = vpop.f32.mrf.mxu3 }
 0x243   :  { %v302_v6 = vadd.f32 %v301_v4, %v280_v0  ;;  %v325_v7 = vadd.f32 %v324_v5, %v281_v1  ;;  %v153_v4 = vperm.slane %v810_v20, 1 }
 0x245   :  { %v330_v8 = vmax.f32 %v302_v6, 0.0  ;;  %v413_v9 = vadd.f32 %v407_v3, %v325_v7  ;;  %v197_v7 = vadd.f32 %v831_v58, %v153_v4 }
 0x247   :  { %v415_v11 = vmax.f32 %v413_v9, 0.0  ;;  %v336_v12 = vmul.f32 %v547_v61, %v330_v8 }
 0x249   :  { %338 = vadd.xlane.f32.xlu0 %v336_v12  ;;  %v421_v13 = vmul.f32 %v548_v10, %v415_v11  ;;  %v553_v11 = vld [vmem:[%s877_s12] ss:$0 sm:$0xff]  ;;  %s501_s12 = sshll.u32 %s878_s13, 4  ;;  %s502_s12 = int_to_ptr.hbm [resolvable:$true] %s501_s12 }
 0x24a   :  { %v304_v15 = vpop.f32.mrf.mxu2  ;;  %v327_v16 = vpop.f32.mrf.mxu3 }
 0x24b   :  { %v305_v17 = vadd.f32 %v304_v15, %v280_v0  ;;  %v328_v21 = vadd.f32 %v327_v16, %v281_v1  ;;  %423 = vadd.xlane.f32.xlu2 %v421_v13  ;;  %v471_v0 = vlaneseq  ;;  %v551_v1 = vld [vmem:[%s874_s8] ss:$0 sm:$0xff]  ;;  %s709_s8 = smov [#allocation12]  }
 0x24d   :  { %v331_v22 = vmax.f32 %v305_v17, 0.0  ;;  %v414_v23 = vadd.f32 %v410_v14, %v328_v21  ;;  %v472_v3 = vand.u32 127, %v471_v0  ;;  %v200_v14 = vadd.f32 %v836_v2, %v153_v4 }
 0x24f   :  { %v416_v24 = vmax.f32 %v414_v23, 0.0  ;;  %v337_v25 = vmul.f32 %v547_v61, %v331_v22  ;;  %vm474_vm8 = vcmp.eq.s32.totalorder %v472_v3, 1  ;;  %vm473_vm9 = vcmp.eq.s32.totalorder %v472_v3, 0  ;;  %v552_v61 = vld [vmem:[%s876_s11] ss:$0 sm:$0xff]  ;;  %s499_s11 = sshll.u32 %s709_s8, 4  ;;  %s500_s11 = int_to_ptr.vmem [resolvable:$true] %s499_s11 }
 0x251   :  { %340 = vadd.xlane.f32.xlu1 %v337_v25  ;;  %v422_v26 = vmul.f32 %v548_v10, %v416_v24 }
 0x253   :  { %425 = vadd.xlane.f32.xlu2 %v422_v26 }
 0x2bc   :  { %v339_v30 = vpop.xlane.xlu0 %338 }
 0x2bd   :  { %v346_v31 = vadd.f32 %v549_v28, %v339_v30 }
 0x2be   :  { %v424_v32 = vpop.xlane.xlu2 %423 }
 0x2bf   :  { %v348_v33 = vmul.f32 0.5, %v346_v31  ;;  %v431_v34 = vadd.f32 %v550_v29, %v424_v32 }
 0x2c1   :  { %562 = vtanh.f32 %v348_v33  ;;  %v433_v35 = vmul.f32 0.5, %v431_v34 }
 0x2c3   :  { %564 = vtanh.f32 %v433_v35 }
 0x2c4   :  { %v341_v36 = vpop.xlane.xlu1 %340 }
 0x2c5   :  { %v347_v37 = vadd.f32 %v549_v28, %v341_v36 }
 0x2c6   :  { %v426_v38 = vpop.xlane.xlu2 %425 }
 0x2c7   :  { %v563_v18 = vpop.eup %562  ;;  %v349_v39 = vmul.f32 0.5, %v347_v37  ;;  %v432_v40 = vadd.f32 %v550_v29, %v426_v38 }
 0x2c8   :  { %v352_v41 = vadd.f32 1.0, %v563_v18 }
 0x2c9   :  { %v565_v42 = vpop.eup %564  ;;  %566 = vtanh.f32 %v349_v39  ;;  %v434_v43 = vmul.f32 0.5, %v432_v40 }
 0x2ca   :  { %v354_v45 = vmul.f32 0.5, %v352_v41  ;;  %v437_v19 = vadd.f32 1.0, %v565_v42 }
 0x2cb   :  { %568 = vtanh.f32 %v434_v43 }
 0x2cc   :  { %v439_v46 = vmul.f32 0.5, %v437_v19  ;;  %359 = vperm.xlu2 %544, %v354_v45  }
 0x2ce   :  { %v443_v48 = vmul.f32 0.1, %v439_v46 }
 0x2cf   :  { %v567_v49 = vpop.eup %566 }
 0x2d0   :  { %v353_v50 = vadd.f32 1.0, %v567_v49  ;;  %v445_v51 = vadd.f32 %v443_v48, %v441_v47 }
 0x2d1   :  { %v569_v52 = vpop.eup %568 }
 0x2d2   :  { %v355_v54 = vmul.f32 0.5, %v353_v50  ;;  %v438_v55 = vadd.f32 1.0, %v569_v52  ;;  %450 = vperm.xlu1 %546, %v445_v51  }
 0x2d4   :  { %v440_v56 = vmul.f32 0.5, %v438_v55  ;;  %364 = vperm.xlu0 %545, %v355_v54  }
 0x2d6   :  { %v444_v59 = vmul.f32 0.1, %v440_v56 }
 0x2d8   :  { %v446_v60 = vadd.f32 %v444_v59, %v442_v57 }
 0x2da   :  { %482 = vperm.xlu1 %546, %v440_v56   ;;  %455 = vperm.xlu2 %544, %v446_v60  }
 0x2e2   :  { %477 = vperm.xlu2 %544, %v439_v46  }
 0x326   :  { %v360_v62 = vpop.permute.xlu2 %359 }
 0x327   :  { %v370_v5 = vmul.f32 %v551_v1, %v360_v62 }
 0x329   :  { %v372_v10 = vadd.f32 %v370_v5, %v197_v7 }
 0x334   :  { %v456_v63 = vpop.permute.xlu2 %455 }
 0x335   :  { %v462_v16 = vmul.f32 %v552_v61, %v456_v63 }
 0x33c   :  { %v478_v6 = vpop.permute.xlu2 %477 }
 0x33d   :  { %v485_v8 = vsel %vm474_vm8, %v478_v6, 0.0 }
 0x344   :  { %v451_v9 = vpop.permute.xlu1 %450 }
 0x345   :  { %v461_v12 = vmul.f32 %v552_v61, %v451_v9  ;;  %v487_v20 = vsel %vm473_vm9, %v451_v9, %v485_v8 }
 0x346   :  { %491 = vst [vmem:[#allocation12 + $0x10] sm:$0xff] %v487_v20  ;;  %v365_v13 = vpop.permute.xlu0 %364 }
 0x347   :  { %v463_v58 = vadd.f32 %v461_v12, %v372_v10  ;;  %v371_v15 = vmul.f32 %v551_v1, %v365_v13 }
 0x349   :  { %v469_v17 = vadd.f32 %v553_v11, %v463_v58  ;;  %v373_v21 = vadd.f32 %v371_v15, %v200_v14 }
 0x34b   :  { %489 = vst [vmem:[#allocation12] sm:$0xff] %v469_v17  ;;  %v464_v22 = vadd.f32 %v462_v16, %v373_v21 }
 0x34c   :  { %v483_v23 = vpop.permute.xlu1 %482 }
 0x34d   :  { %v470_v24 = vadd.f32 %v553_v11, %v464_v22  ;;  %v486_v25 = vsel %vm474_vm8, %v483_v23, 0.0 }
 0x34e   :  { %v488_v26 = vsel %vm473_vm9, %v456_v63, %v486_v25 }
 0x34f   :  { %492 = vst [vmem:[#allocation12 + $0x18] sm:$0xff] %v470_v24 }
 0x350   :  { %494 = vst [vmem:[#allocation12 + $0x28] sm:$0xff] %v488_v26 }
 0x351   :  { %507 = dma.vmem_to_hbm [thread:$0]  %s500_s11, 768, %s502_s12, [#allocation6], %s702_s22, %s702_s22, %s703_s23  }
 0x352   :  { %696 = dma.done.wait [#allocation6], 768  }
 0x353   :  { %697 = vsyncadd [#allocation6], 4294966528 }
 0x354   :  { %512 = vsyncpa [#allocation5], 1 }
 0x355   :  { %513 = vsyncpa [#allocation8], 1 }
 0x356   :  { %514 = vsyncpa [#allocation11], 1 }
 0x357   :  { %515 = vsyncpa [#allocation6], 1 }

// kernel: tpu_custom_call.1
= control target key start
LH: loop header
LB: loop body
LE: loop exit
PB: predicated region body
PF: predicated region fallthrough
CT: control target
= control target key end

     0   :  { %s866_s0 = inlined_call_operand.hbm [shape: f32[16,384], index: 0, kind: input, shape index: {}]   ;;  %s867_s1 = inlined_call_operand.hbm [shape: f32[128,256], index: 1, kind: input, shape index: {}]   ;;  %s868_s2 = inlined_call_operand.vmem [shape: f32[1,256], index: 2, kind: input, shape index: {}]   ;;  %s869_s3 = inlined_call_operand.hbm [shape: f32[128,256], index: 3, kind: input, shape index: {}]   ;;  %s870_s4 = inlined_call_operand.vmem [shape: f32[1,256], index: 4, kind: input, shape index: {}]   ;;  %s871_s5 = inlined_call_operand.hbm [shape: f32[128,128], index: 5, kind: input, shape index: {}]   ;;  %s872_s6 = inlined_call_operand.vmem [shape: f32[1,128], index: 6, kind: input, shape index: {}]   ;;  %s873_s7 = inlined_call_operand.<no memory space> [shape: f32[1,1], index: 7, kind: input, shape index: {}]   ;;  %s874_s8 = inlined_call_operand.vmem [shape: f32[1,128], index: 8, kind: input, shape index: {}]   ;;  %s875_s9 = inlined_call_operand.vmem [shape: f32[1,128], index: 9, kind: input, shape index: {}]   ;;  %s876_s11 = inlined_call_operand.vmem [shape: f32[1,128], index: 11, kind: input, shape index: {}]   ;;  %s877_s12 = inlined_call_operand.vmem [shape: f32[1,128], index: 12, kind: input, shape index: {}]   ;;  %s878_s13 = inlined_call_operand.hbm [shape: f32[16,384], index: 13, kind: output, shape index: {}]   ;;  %s879_s10 = inlined_call_operand.<no memory space> [shape: f32[1,1], index: 10, kind: input, shape index: {}]  }
   0x1   :  { %v18_v0 = vstv %s873_s7  ;;  %v20_v1 = vstv %s879_s10 }
   0x2   :  { %19 = vst [vmem:[#allocation2] sm:$0x1] %v18_v0 }
   0x3   :  { %21 = vst [vmem:[#allocation3] sm:$0x1] %v20_v1 }
   0x4   :  { %22 = vsyncpa [#allocation5], 0 }
   0x5   :  { %23 = vsyncpa [#allocation8], 0 }
   0x6   :  { %24 = vsyncpa [#allocation11], 0  ;;  %s43_s14 = sshll.u32 %s867_s1, 4  ;;  %s44_s14 = int_to_ptr.hbm [resolvable:$true] %s43_s14 }
   0x7   :  { %25 = vsyncpa [#allocation6], 0  ;;  %s698_s15 = smov [#allocation7]   ;;  %s30_s18 = sshll.u32 %s866_s0, 4  ;;  %s31_s18 = int_to_ptr.hbm [resolvable:$true] %s30_s18 }
   0x8   :  { %s45_s16 = sshll.u32 %s698_s15, 4  ;;  %s699_s19 = smov 256   ;;  %s46_s16 = int_to_ptr.vmem [resolvable:$true] %s45_s16 }
   0x9   :  { %s700_s10 = smov 16   ;;  %s701_s20 = smov [#allocation4]  }
   0xa   :  { %51 = dma.hbm_to_vmem [thread:$0]  %s44_s14, 4096, %s46_s16, [#allocation8], %s699_s19, %s699_s19, %s700_s10  }
   0xb   :  { %s32_s21 = sshll.u32 %s701_s20, 4  ;;  %s702_s22 = smov 384   ;;  %s33_s21 = int_to_ptr.vmem [resolvable:$true] %s32_s21 }
   0xc   :  { %s703_s23 = smov 24   ;;  %s58_s25 = sshll.u32 %s869_s3, 4  ;;  %s59_s25 = int_to_ptr.hbm [resolvable:$true] %s58_s25 }
   0xd   :  { %38 = dma.hbm_to_vmem [thread:$0]  %s31_s18, 768, %s33_s21, [#allocation5], %s702_s22, %s702_s22, %s703_s23  }
   0xe   :  { %s704_s26 = smov [#allocation9]   ;;  %s73_s29 = sshll.u32 %s871_s5, 4  ;;  %s74_s29 = int_to_ptr.hbm [resolvable:$true] %s73_s29 }
   0xf   :  { %s60_s0 = sshll.u32 %s704_s26, 4  ;;  %s705_s30 = smov [#allocation10]   ;;  %s61_s0 = int_to_ptr.vmem [resolvable:$true] %s60_s0 }
  0x10   :  { %66 = dma.hbm_to_vmem [thread:$0]  %s59_s25, 4096, %s61_s0, [#allocation8], %s699_s19, %s699_s19, %s700_s10  }
  0x11   :  { %s75_s14 = sshll.u32 %s705_s30, 4  ;;  %s706_s15 = smov 128   ;;  %s76_s14 = int_to_ptr.vmem [resolvable:$true] %s75_s14 }
  0x12   :  { %s707_s16 = smov 8  }
  0x13   :  { %81 = dma.hbm_to_vmem [thread:$0]  %s74_s29, 2048, %s76_s14, [#allocation11], %s706_s15, %s706_s15, %s707_s16  }
  0x14   :  { %690 = dma.done.wait [#allocation5], 768  }
  0x15   :  { %691 = vsyncadd [#allocation5], 4294966528 }
  0x16   :  { %692 = dma.done.wait [#allocation8], 8192  }
  0x17   :  { %693 = vsyncadd [#allocation8], 4294959104 }
  0x18   :  { %694 = dma.done.wait [#allocation11], 2048  }
  0x19   :  { %695 = vsyncadd [#allocation11], 4294965248  ;;  %v148_v2 = vld [vmem:[#allocation7 + $0xf0] sm:$0xff]  ;;  %v146_v3 = vld [vmem:[#allocation7 + $0xe0] sm:$0xff] }
  0x1a   :  { %156 = vmatpush.msra.mxu0 %v148_v2  ;;  %v144_v4 = vld [vmem:[#allocation7 + $0xd0] sm:$0xff]  ;;  %v142_v5 = vld [vmem:[#allocation7 + $0xc0] sm:$0xff]  ;;  %v804_v19 = vld [vmem:[#allocation4 + $0x18] sm:$0xff] }
  0x1b   :  { %v140_v6 = vld [vmem:[#allocation7 + $0xb0] sm:$0xff]  ;;  %v138_v7 = vld [vmem:[#allocation7 + $0xa0] sm:$0xff]  ;;  %v810_v20 = vld [vmem:[%s868_s2] sm:$0x3] }
  0x1c   :  { %157 = vmatpush.msra.mxu0 %v146_v3  ;;  %v136_v8 = vld [vmem:[#allocation7 + $0x90] sm:$0xff]  ;;  %v134_v9 = vld [vmem:[#allocation7 + $0x80] sm:$0xff]  ;;  %v152_v21 = vperm.slane %v810_v20, 0  ;;  %v149_v26 = vld [vmem:[#allocation7 + $0xf8] sm:$0xff] }
  0x1d   :  { %v132_v10 = vld [vmem:[#allocation7 + $0x70] sm:$0xff]  ;;  %v130_v11 = vld [vmem:[#allocation7 + $0x60] sm:$0xff]  ;;  %v147_v27 = vld [vmem:[#allocation7 + $0xe8] sm:$0xff]  ;;  %179 = vmatpush.msra.mxu1 %v149_v26 }
  0x1e   :  { %158 = vmatpush.msra.mxu0 %v144_v4  ;;  %v128_v12 = vld [vmem:[#allocation7 + $0x50] sm:$0xff]  ;;  %v126_v13 = vld [vmem:[#allocation7 + $0x40] sm:$0xff]  ;;  %v145_v28 = vld [vmem:[#allocation7 + $0xd8] sm:$0xff] }
  0x1f   :  { %v124_v14 = vld [vmem:[#allocation7 + $0x30] sm:$0xff]  ;;  %v122_v15 = vld [vmem:[#allocation7 + $0x20] sm:$0xff]  ;;  %180 = vmatpush.msra.mxu1 %v147_v27  ;;  %v277_v30 = vld [vmem:[#allocation9 + $0xf8] sm:$0xff] }
  0x20   :  { %159 = vmatpush.msra.mxu0 %v142_v5  ;;  %v120_v16 = vld [vmem:[#allocation7 + $0x10] sm:$0xff]  ;;  %v118_v17 = vld [vmem:[#allocation7] sm:$0xff]  ;;  %v143_v32 = vld [vmem:[#allocation7 + $0xc8] sm:$0xff]  ;;  %307 = vmatpush.msra.mxu3 %v277_v30 }
  0x21   :  { %v801_v18 = vld [vmem:[#allocation4] sm:$0xff]  ;;  %v274_v31 = vld [vmem:[#allocation9 + $0xe0] sm:$0xff]  ;;  %v275_v33 = vld [vmem:[#allocation9 + $0xe8] sm:$0xff]  ;;  %181 = vmatpush.msra.mxu1 %v145_v28 }
  0x22   :  { %160 = vmatpush.msra.mxu0 %v140_v6  ;;  %v276_v29 = vld [vmem:[#allocation9 + $0xf0] sm:$0xff]  ;;  %v273_v35 = vld [vmem:[#allocation9 + $0xd8] sm:$0xff]  ;;  %308 = vmatpush.msra.mxu3 %v275_v33  ;;  %v270_v37 = vld [vmem:[#allocation9 + $0xc0] sm:$0xff] }
  0x23   :  { %284 = vmatpush.msra.mxu2 %v276_v29  ;;  %v272_v34 = vld [vmem:[#allocation9 + $0xd0] sm:$0xff]  ;;  %v141_v36 = vld [vmem:[#allocation7 + $0xb8] sm:$0xff]  ;;  %182 = vmatpush.msra.mxu1 %v143_v32  ;;  %v271_v38 = vld [vmem:[#allocation9 + $0xc8] sm:$0xff] }
  0x24   :  { %161 = vmatpush.msra.mxu0 %v138_v7  ;;  %v813_v39 = vld [vmem:[#allocation10 + $0x78] sm:$0xff]  ;;  %v139_v40 = vld [vmem:[#allocation7 + $0xa8] sm:$0xff]  ;;  %309 = vmatpush.msra.mxu3 %v273_v35  ;;  %v268_v41 = vld [vmem:[#allocation9 + $0xb0] sm:$0xff] }
  0x25   :  { %285 = vmatpush.msra.mxu2 %v274_v31  ;;  %v816_v42 = vld [vmem:[#allocation10 + $0x70] sm:$0xff]  ;;  %183 = vmatpush.msra.mxu1 %v141_v36  ;;  %v269_v43 = vld [vmem:[#allocation9 + $0xb8] sm:$0xff]  ;;  %v266_v45 = vld [vmem:[#allocation9 + $0xa0] sm:$0xff] }
  0x26   :  { %162 = vmatpush.msra.mxu0 %v136_v8  ;;  %v137_v44 = vld [vmem:[#allocation7 + $0x98] sm:$0xff]  ;;  %310 = vmatpush.msra.mxu3 %v271_v38  ;;  %v267_v46 = vld [vmem:[#allocation9 + $0xa8] sm:$0xff]  ;;  %v264_v62 = vld [vmem:[#allocation9 + $0x90] sm:$0xff] }
  0x27   :  { %286 = vmatpush.msra.mxu2 %v272_v34  ;;  %184 = vmatpush.msra.mxu1 %v139_v40  ;;  %v135_v48 = vld [vmem:[#allocation7 + $0x88] sm:$0xff]  ;;  %v133_v50 = vld [vmem:[#allocation7 + $0x78] sm:$0xff]  ;;  %v262_v2 = vld [vmem:[#allocation9 + $0x80] sm:$0xff] }
  0x28   :  { %163 = vmatpush.msra.mxu0 %v134_v9  ;;  %311 = vmatpush.msra.mxu3 %v269_v43  ;;  %v131_v52 = vld [vmem:[#allocation7 + $0x68] sm:$0xff]  ;;  %v129_v53 = vld [vmem:[#allocation7 + $0x58] sm:$0xff]  ;;  %v386_v4 = vld [vmem:[#allocation10 + $0x60] sm:$0xff] }
  0x29   :  { %287 = vmatpush.msra.mxu2 %v270_v37  ;;  %185 = vmatpush.msra.mxu1 %v137_v44  ;;  %v127_v55 = vld [vmem:[#allocation7 + $0x48] sm:$0xff]  ;;  %v125_v57 = vld [vmem:[#allocation7 + $0x38] sm:$0xff]  ;;  %v260_v6 = vld [vmem:[#allocation9 + $0x70] sm:$0xff] }
  0x2a   :  { %164 = vmatpush.msra.mxu0 %v132_v10  ;;  %312 = vmatpush.msra.mxu3 %v267_v46  ;;  %v123_v60 = vld [vmem:[#allocation7 + $0x28] sm:$0xff]  ;;  %v265_v63 = vld [vmem:[#allocation9 + $0x98] sm:$0xff]  ;;  %v258_v9 = vld [vmem:[#allocation9 + $0x60] sm:$0xff] }
  0x2b   :  { %288 = vmatpush.msra.mxu2 %v268_v41  ;;  %186 = vmatpush.msra.mxu1 %v135_v48  ;;  %v387_v0 = vld [vmem:[#allocation10 + $0x68] sm:$0xff]  ;;  %v121_v1 = vld [vmem:[#allocation7 + $0x18] sm:$0xff]  ;;  %v380_v26 = vld [vmem:[#allocation10 + $0x30] sm:$0xff] }
  0x2c   :  { %165 = vmatpush.msra.mxu0 %v130_v11  ;;  %313 = vmatpush.msra.mxu3 %v265_v63  ;;  %v263_v3 = vld [vmem:[#allocation9 + $0x88] sm:$0xff]  ;;  %v261_v7 = vld [vmem:[#allocation9 + $0x78] sm:$0xff]  ;;  %v384_v11 = vld [vmem:[#allocation10 + $0x50] sm:$0xff] }
  0x2d   :  { %289 = vmatpush.msra.mxu2 %v266_v45  ;;  %187 = vmatpush.msra.mxu1 %v133_v50  ;;  %v119_v5 = vld [vmem:[#allocation7 + $0x8] sm:$0xff]  ;;  %v385_v8 = vld [vmem:[#allocation10 + $0x58] sm:$0xff]  ;;  %v248_v27 = vld [vmem:[#allocation9 + $0x10] sm:$0xff] }
  0x2e   :  { %166 = vmatpush.msra.mxu0 %v128_v12  ;;  %314 = vmatpush.msra.mxu3 %v263_v3  ;;  %v259_v10 = vld [vmem:[#allocation9 + $0x68] sm:$0xff]  ;;  %v256_v12 = vld [vmem:[#allocation9 + $0x50] sm:$0xff]  ;;  %v249_v28 = vld [vmem:[#allocation9 + $0x18] sm:$0xff] }
  0x2f   :  { %188 = vmatpush.msra.mxu1 %v131_v52  ;;  %290 = vmatpush.msra.mxu2 %v264_v62  ;;  %v379_v29 = vld [vmem:[#allocation10 + $0x28] sm:$0xff]  ;;  %v246_v30 = vld [vmem:[#allocation9] sm:$0xff]  ;;  %v377_v33 = vld [vmem:[#allocation10 + $0x18] sm:$0xff] }
  0x30   :  { %167 = vmatpush.msra.mxu0 %v126_v13  ;;  %315 = vmatpush.msra.mxu3 %v261_v7  ;;  %v257_v13 = vld [vmem:[#allocation9 + $0x58] sm:$0xff]  ;;  %v247_v31 = vld [vmem:[#allocation9 + $0x8] sm:$0xff]  ;;  %v378_v32 = vld [vmem:[#allocation10 + $0x20] sm:$0xff] }
  0x31   :  { %189 = vmatpush.msra.mxu1 %v129_v53  ;;  %291 = vmatpush.msra.mxu2 %v262_v2  ;;  %v376_v34 = vld [vmem:[#allocation10 + $0x10] sm:$0xff]  ;;  %v375_v35 = vld [vmem:[#allocation10 + $0x8] sm:$0xff]  ;;  %v374_v36 = vld [vmem:[#allocation10] sm:$0xff] }
  0x32   :  { %168 = vmatpush.msra.mxu0 %v124_v14  ;;  %316 = vmatpush.msra.mxu3 %v259_v10  ;;  %v383_v14 = vld [vmem:[#allocation10 + $0x48] sm:$0xff]  ;;  %v114_v37 = vld [vmem:[#allocation4 + $0x8] sm:$0xff] }
  0x33   :  { %190 = vmatpush.msra.mxu1 %v127_v55  ;;  %292 = vmatpush.msra.mxu2 %v260_v6  ;;  %v278_v63 = vld [vmem:[%s870_s4] sm:$0x3] }
  0x34   :  { %169 = vmatpush.msra.mxu0 %v122_v15  ;;  %317 = vmatpush.msra.mxu3 %v257_v13  ;;  %v254_v15 = vld [vmem:[#allocation9 + $0x40] sm:$0xff]  ;;  %v548_v10 = vld [vmem:[%s875_s9] ss:$0 sm:$0xff] }
  0x35   :  { %191 = vmatpush.msra.mxu1 %v125_v57  ;;  %293 = vmatpush.msra.mxu2 %v258_v9 }
  0x36   :  { %170 = vmatpush.msra.mxu0 %v120_v16  ;;  %v255_v16 = vld [vmem:[#allocation9 + $0x48] sm:$0xff] }
  0x37   :  { %192 = vmatpush.msra.mxu1 %v123_v60  ;;  %294 = vmatpush.msra.mxu2 %v256_v12 }
  0x38   :  { %171 = vmatpush.msra.mxu0 %v118_v17  ;;  %v382_v17 = vld [vmem:[#allocation10 + $0x40] sm:$0xff]  ;;  %318 = vmatpush.msra.mxu3 %v255_v16 }
  0x39   :  { %172 = vmatmul.f32.vlgmr.msra.gmra.mxu0 %v801_v18  ;;  %193 = vmatpush.msra.mxu1 %v121_v1  ;;  %v281_v1 = vperm.slane %v278_v63, 1 }
  0x3a   :  { %390 = vmatpush.msrb.mxu0 %v813_v39  ;;  %295 = vmatpush.msra.mxu2 %v254_v15 }
  0x3b   :  { %194 = vmatpush.msra.mxu1 %v119_v5 }
  0x3c   :  { %391 = vmatpush.msrb.mxu0 %v816_v42  ;;  %195 = vmatmul.f32.vlgmr.msra.gmra.mxu1 %v801_v18  ;;  %v115_v18 = vld [vmem:[#allocation4 + $0x20] sm:$0xff] }
  0x3d   :  { %516 = vmatpush.msrb.mxu1 %v813_v39 }
  0x3e   :  { %392 = vmatpush.msrb.mxu0 %v387_v0 }
  0x3f   :  { %517 = vmatpush.msrb.mxu1 %v816_v42 }
  0x40   :  { %393 = vmatpush.msrb.mxu0 %v386_v4 }
  0x41   :  { %175 = vmatmul.f32.gmra.mxu0 %v804_v19  ;;  %518 = vmatpush.msrb.mxu1 %v387_v0  ;;  %v280_v0 = vperm.slane %v278_v63, 0 }
  0x42   :  { %394 = vmatpush.msrb.mxu0 %v385_v8 }
  0x43   :  { %519 = vmatpush.msrb.mxu1 %v386_v4 }
  0x44   :  { %395 = vmatpush.msrb.mxu0 %v384_v11  ;;  %198 = vmatmul.f32.gmra.mxu1 %v804_v19 }
  0x45   :  { %520 = vmatpush.msrb.mxu1 %v385_v8 }
  0x46   :  { %396 = vmatpush.msrb.mxu0 %v383_v14 }
  0x47   :  { %521 = vmatpush.msrb.mxu1 %v384_v11 }
  0x48   :  { %397 = vmatpush.msrb.mxu0 %v382_v17 }
  0x49   :  { %522 = vmatpush.msrb.mxu1 %v383_v14 }
  0x4b   :  { %523 = vmatpush.msrb.mxu1 %v382_v17 }
  0xb6   :  { %v173_v22 = vpop.f32.mrf.mxu0 }
  0xb7   :  { %v174_v23 = vadd.f32 %v173_v22, %v152_v21  ;;  %v253_v22 = vld [vmem:[#allocation9 + $0x38] sm:$0xff] }
  0xb8   :  { %319 = vmatpush.msra.mxu3 %v253_v22 }
  0xb9   :  { %202 = vmax.xlane.f32.xlu0 %v174_v23 }
  0xbe   :  { %v176_v24 = vpop.f32.mrf.mxu0 }
  0xbf   :  { %v177_v25 = vadd.f32 %v176_v24, %v152_v21  ;;  %v252_v21 = vld [vmem:[#allocation9 + $0x30] sm:$0xff]  ;;  %v250_v24 = vld [vmem:[#allocation9 + $0x20] sm:$0xff] }
  0xc0   :  { %296 = vmatpush.msra.mxu2 %v252_v21 }
  0xc1   :  { %204 = vmax.xlane.f32.xlu0 %v177_v25 }
  0xc2   :  { %297 = vmatpush.msra.mxu2 %v250_v24 }
  0xc4   :  { %298 = vmatpush.msra.mxu2 %v248_v27  ;;  %v708_v27 = vmov 0  }
  0xc5   :  { %544 = vset.pattern.permute.xlu2 %v708_v27  ;;  %546 = vset.pattern.permute.xlu1 %v708_v27 }
  0xc6   :  { %299 = vmatpush.msra.mxu2 %v246_v30  ;;  %545 = vset.pattern.permute.xlu0 %v708_v27 }
 0x12c   :  { %v203_v47 = vpop.xlane.xlu0 %202 }
 0x12d   :  { %v206_v49 = vsub.f32 %v174_v23, %v203_v47  ;;  %v381_v23 = vld [vmem:[#allocation10 + $0x38] sm:$0xff] }
 0x12e   :  { %398 = vmatpush.msrb.mxu0 %v381_v23  ;;  %524 = vmatpush.msrb.mxu1 %v381_v23 }
 0x12f   :  { %v208_v51 = vmul.f32 1.442695, %v206_v49 }
 0x130   :  { %399 = vmatpush.msrb.mxu0 %v380_v26  ;;  %525 = vmatpush.msrb.mxu1 %v380_v26 }
 0x131   :  { %554 = vpow2.f32 %v208_v51 }
 0x132   :  { %400 = vmatpush.msrb.mxu0 %v379_v29  ;;  %526 = vmatpush.msrb.mxu1 %v379_v29  ;;  %v550_v29 = vld [vmem:[#allocation3] ss:$0 sm:$0xff] }
 0x134   :  { %v205_v54 = vpop.xlane.xlu0 %204  ;;  %401 = vmatpush.msrb.mxu0 %v378_v32  ;;  %527 = vmatpush.msrb.mxu1 %v378_v32 }
 0x135   :  { %v207_v56 = vsub.f32 %v177_v25, %v205_v54  ;;  %v251_v25 = vld [vmem:[#allocation9 + $0x28] sm:$0xff] }
 0x136   :  { %320 = vmatpush.msra.mxu3 %v251_v25  ;;  %402 = vmatpush.msrb.mxu0 %v377_v33 }
 0x137   :  { %v819_v58 = vpop.eup %554  ;;  %v210_v59 = vmul.f32 1.442695, %v207_v56  ;;  %528 = vmatpush.msrb.mxu1 %v377_v33 }
 0x138   :  { %212 = vadd.xlane.f32.xlu1 %v819_v58  ;;  %321 = vmatpush.msra.mxu3 %v249_v28  ;;  %v549_v28 = vld [vmem:[#allocation2] ss:$0 sm:$0xff] }
 0x139   :  { %556 = vpow2.f32 %v210_v59  ;;  %403 = vmatpush.msrb.mxu0 %v376_v34  ;;  %529 = vmatpush.msrb.mxu1 %v376_v34 }
 0x13a   :  { %322 = vmatpush.msra.mxu3 %v247_v31 }
 0x13b   :  { %404 = vmatpush.msrb.mxu0 %v375_v35  ;;  %530 = vmatpush.msrb.mxu1 %v375_v35 }
 0x13d   :  { %405 = vmatpush.msrb.mxu0 %v374_v36  ;;  %531 = vmatpush.msrb.mxu1 %v374_v36 }
 0x13e   :  { %406 = vmatmul.f32.vlgmr.msrb.gmra.mxu0 %v114_v37  ;;  %409 = vmatmul.f32.vlgmr.msrb.gmra.mxu1 %v115_v18 }
 0x13f   :  { %v822_v61 = vpop.eup %556 }
 0x140   :  { %214 = vadd.xlane.f32.xlu1 %v822_v61 }
 0x1ab   :  { %v213_v38 = vpop.xlane.xlu1 %212 }
 0x1ac   :  { %558 = vrcp.f32 %v213_v38  ;;  %v227_v43 = vand.u32 2147483648, %v213_v38  ;;  %v225_v45 = vand.u32 2147483647, %v213_v38  ;;  %vm221_vm1 = vweird.f32 %v213_v38 }
 0x1ae   :  { %v228_v47 = vor.u32 1.1754944e-38, %v227_v43  ;;  %vm226_vm3 = vcmp.eq.f32.partialorder %v225_v45, 8.507059e+37 }
 0x1b2   :  { %v559_v39 = vpop.eup %558 }
 0x1b3   :  { %v217_v40 = vmul.f32 %v559_v39, %v213_v38  ;;  %v215_v41 = vpop.xlane.xlu1 %214  ;;  %vm222_vm0 = vweird.f32 %v559_v39 }
 0x1b4   :  { %560 = vrcp.f32 %v215_v41  ;;  %vm223_vm2 = vmor %vm221_vm1, %vm222_vm0  ;;  %v241_v53 = vand.u32 2147483648, %v215_v41  ;;  %v239_v55 = vand.u32 2147483647, %v215_v41  ;;  %vm235_vm5 = vweird.f32 %v215_v41 }
 0x1b5   :  { %v218_v42 = vsub.f32 1.0, %v217_v40 }
 0x1b6   :  { %v242_v57 = vor.u32 1.1754944e-38, %v241_v53  ;;  %vm240_vm7 = vcmp.eq.f32.partialorder %v239_v55, 8.507059e+37  ;;  %v117_v53 = vld [vmem:[#allocation4 + $0x28] sm:$0xff] }
 0x1b7   :  { %v219_v44 = vmul.f32 %v559_v39, %v218_v42 }
 0x1b9   :  { %v220_v19 = vadd.f32 %v559_v39, %v219_v44  ;;  %v116_v44 = vld [vmem:[#allocation4 + $0x10] sm:$0xff] }
 0x1ba   :  { %v561_v46 = vpop.eup %560 }
 0x1bb   :  { %v231_v48 = vmul.f32 %v561_v46, %v215_v41  ;;  %v224_v49 = vsel %vm223_vm2, %v559_v39, %v220_v19  ;;  %vm236_vm4 = vweird.f32 %v561_v46  ;;  %v407_v3 = vpop.f32.mrf.mxu0 }
 0x1bc   :  { %v229_v50 = vsel %vm226_vm3, %v228_v47, %v224_v49  ;;  %vm237_vm6 = vmor %vm235_vm5, %vm236_vm4  ;;  %v441_v47 = vmul.f32 0.9, %v116_v44 }
 0x1bd   :  { %v232_v51 = vsub.f32 1.0, %v231_v48  ;;  %v244_v52 = vmul.f32 %v819_v58, %v229_v50  ;;  %v831_v58 = vpop.f32.mrf.mxu1 }
 0x1bf   :  { %v233_v54 = vmul.f32 %v561_v46, %v232_v51  ;;  %300 = vmatmul.f32.vlgmr.msra.gmra.mxu2 %v244_v52  ;;  %490 = vst [vmem:[#allocation12 + $0x8] sm:$0xff] %v244_v52  ;;  %323 = vmatmul.f32.vlgmr.msra.gmra.mxu3 %v244_v52 }
 0x1c1   :  { %v234_v56 = vadd.f32 %v561_v46, %v233_v54 }
 0x1c3   :  { %v238_v59 = vsel %vm237_vm6, %v561_v46, %v234_v56 }
 0x1c4   :  { %v243_v60 = vsel %vm240_vm7, %v242_v57, %v238_v59  ;;  %v442_v57 = vmul.f32 0.9, %v117_v53 }
 0x1c5   :  { %v245_v62 = vmul.f32 %v822_v61, %v243_v60  ;;  %v836_v2 = vpop.f32.mrf.mxu1  ;;  %v547_v61 = vld [vmem:[%s872_s6] ss:$0 sm:$0xff] }
 0x1c7   :  { %303 = vmatmul.f32.gmra.mxu2 %v245_v62  ;;  %493 = vst [vmem:[#allocation12 + $0x20] sm:$0xff] %v245_v62  ;;  %326 = vmatmul.f32.gmra.mxu3 %v245_v62 }
 0x1cd   :  { %v410_v14 = vpop.f32.mrf.mxu1 }
 0x242   :  { %v301_v4 = vpop.f32.mrf.mxu2  ;;  %v324_v5 = vpop.f32.mrf.mxu3 }
 0x243   :  { %v302_v6 = vadd.f32 %v301_v4, %v280_v0  ;;  %v325_v7 = vadd.f32 %v324_v5, %v281_v1  ;;  %v153_v4 = vperm.slane %v810_v20, 1 }
 0x245   :  { %v330_v8 = vmax.f32 %v302_v6, 0.0  ;;  %v413_v9 = vadd.f32 %v407_v3, %v325_v7  ;;  %v197_v7 = vadd.f32 %v831_v58, %v153_v4 }
 0x247   :  { %v415_v11 = vmax.f32 %v413_v9, 0.0  ;;  %v336_v12 = vmul.f32 %v547_v61, %v330_v8 }
 0x249   :  { %338 = vadd.xlane.f32.xlu0 %v336_v12  ;;  %v421_v13 = vmul.f32 %v548_v10, %v415_v11  ;;  %v553_v11 = vld [vmem:[%s877_s12] ss:$0 sm:$0xff]  ;;  %s501_s12 = sshll.u32 %s878_s13, 4  ;;  %s502_s12 = int_to_ptr.hbm [resolvable:$true] %s501_s12 }
 0x24a   :  { %v304_v15 = vpop.f32.mrf.mxu2  ;;  %v327_v16 = vpop.f32.mrf.mxu3 }
 0x24b   :  { %v305_v17 = vadd.f32 %v304_v15, %v280_v0  ;;  %v328_v21 = vadd.f32 %v327_v16, %v281_v1  ;;  %423 = vadd.xlane.f32.xlu2 %v421_v13  ;;  %v471_v0 = vlaneseq  ;;  %v551_v1 = vld [vmem:[%s874_s8] ss:$0 sm:$0xff]  ;;  %s709_s8 = smov [#allocation12]  }
 0x24d   :  { %v331_v22 = vmax.f32 %v305_v17, 0.0  ;;  %v414_v23 = vadd.f32 %v410_v14, %v328_v21  ;;  %v472_v3 = vand.u32 127, %v471_v0  ;;  %v200_v14 = vadd.f32 %v836_v2, %v153_v4 }
 0x24f   :  { %v416_v24 = vmax.f32 %v414_v23, 0.0  ;;  %v337_v25 = vmul.f32 %v547_v61, %v331_v22  ;;  %vm474_vm8 = vcmp.eq.s32.totalorder %v472_v3, 1  ;;  %vm473_vm9 = vcmp.eq.s32.totalorder %v472_v3, 0  ;;  %v552_v61 = vld [vmem:[%s876_s11] ss:$0 sm:$0xff]  ;;  %s499_s11 = sshll.u32 %s709_s8, 4  ;;  %s500_s11 = int_to_ptr.vmem [resolvable:$true] %s499_s11 }
 0x251   :  { %340 = vadd.xlane.f32.xlu1 %v337_v25  ;;  %v422_v26 = vmul.f32 %v548_v10, %v416_v24 }
 0x253   :  { %425 = vadd.xlane.f32.xlu2 %v422_v26 }
 0x2bc   :  { %v339_v30 = vpop.xlane.xlu0 %338 }
 0x2bd   :  { %v346_v31 = vadd.f32 %v549_v28, %v339_v30 }
 0x2be   :  { %v424_v32 = vpop.xlane.xlu2 %423 }
 0x2bf   :  { %v348_v33 = vmul.f32 0.5, %v346_v31  ;;  %v431_v34 = vadd.f32 %v550_v29, %v424_v32 }
 0x2c1   :  { %562 = vtanh.f32 %v348_v33  ;;  %v433_v35 = vmul.f32 0.5, %v431_v34 }
 0x2c3   :  { %564 = vtanh.f32 %v433_v35 }
 0x2c4   :  { %v341_v36 = vpop.xlane.xlu1 %340 }
 0x2c5   :  { %v347_v37 = vadd.f32 %v549_v28, %v341_v36 }
 0x2c6   :  { %v426_v38 = vpop.xlane.xlu2 %425 }
 0x2c7   :  { %v563_v18 = vpop.eup %562  ;;  %v349_v39 = vmul.f32 0.5, %v347_v37  ;;  %v432_v40 = vadd.f32 %v550_v29, %v426_v38 }
 0x2c8   :  { %v352_v41 = vadd.f32 1.0, %v563_v18 }
 0x2c9   :  { %v565_v42 = vpop.eup %564  ;;  %566 = vtanh.f32 %v349_v39  ;;  %v434_v43 = vmul.f32 0.5, %v432_v40 }
 0x2ca   :  { %v354_v45 = vmul.f32 0.5, %v352_v41  ;;  %v437_v19 = vadd.f32 1.0, %v565_v42 }
 0x2cb   :  { %568 = vtanh.f32 %v434_v43 }
 0x2cc   :  { %v439_v46 = vmul.f32 0.5, %v437_v19  ;;  %359 = vperm.xlu2 %544, %v354_v45  }
 0x2ce   :  { %v443_v48 = vmul.f32 0.1, %v439_v46 }
 0x2cf   :  { %v567_v49 = vpop.eup %566 }
 0x2d0   :  { %v353_v50 = vadd.f32 1.0, %v567_v49  ;;  %v445_v51 = vadd.f32 %v443_v48, %v441_v47 }
 0x2d1   :  { %v569_v52 = vpop.eup %568 }
 0x2d2   :  { %v355_v54 = vmul.f32 0.5, %v353_v50  ;;  %v438_v55 = vadd.f32 1.0, %v569_v52  ;;  %450 = vperm.xlu1 %546, %v445_v51  }
 0x2d4   :  { %v440_v56 = vmul.f32 0.5, %v438_v55  ;;  %364 = vperm.xlu0 %545, %v355_v54  }
 0x2d6   :  { %v444_v59 = vmul.f32 0.1, %v440_v56 }
 0x2d8   :  { %v446_v60 = vadd.f32 %v444_v59, %v442_v57 }
 0x2da   :  { %482 = vperm.xlu1 %546, %v440_v56   ;;  %455 = vperm.xlu2 %544, %v446_v60  }
 0x2e2   :  { %477 = vperm.xlu2 %544, %v439_v46  }
 0x326   :  { %v360_v62 = vpop.permute.xlu2 %359 }
 0x327   :  { %v370_v5 = vmul.f32 %v551_v1, %v360_v62 }
 0x329   :  { %v372_v10 = vadd.f32 %v370_v5, %v197_v7 }
 0x334   :  { %v456_v63 = vpop.permute.xlu2 %455 }
 0x335   :  { %v462_v16 = vmul.f32 %v552_v61, %v456_v63 }
 0x33c   :  { %v478_v6 = vpop.permute.xlu2 %477 }
 0x33d   :  { %v485_v8 = vsel %vm474_vm8, %v478_v6, 0.0 }
 0x344   :  { %v451_v9 = vpop.permute.xlu1 %450 }
 0x345   :  { %v461_v12 = vmul.f32 %v552_v61, %v451_v9  ;;  %v487_v20 = vsel %vm473_vm9, %v451_v9, %v485_v8 }
 0x346   :  { %491 = vst [vmem:[#allocation12 + $0x10] sm:$0xff] %v487_v20  ;;  %v365_v13 = vpop.permute.xlu0 %364 }
 0x347   :  { %v463_v58 = vadd.f32 %v461_v12, %v372_v10  ;;  %v371_v15 = vmul.f32 %v551_v1, %v365_v13 }
 0x349   :  { %v469_v17 = vadd.f32 %v553_v11, %v463_v58  ;;  %v373_v21 = vadd.f32 %v371_v15, %v200_v14 }
 0x34b   :  { %489 = vst [vmem:[#allocation12] sm:$0xff] %v469_v17  ;;  %v464_v22 = vadd.f32 %v462_v16, %v373_v21 }
 0x34c   :  { %v483_v23 = vpop.permute.xlu1 %482 }
 0x34d   :  { %v470_v24 = vadd.f32 %v553_v11, %v464_v22  ;;  %v486_v25 = vsel %vm474_vm8, %v483_v23, 0.0 }
 0x34e   :  { %v488_v26 = vsel %vm473_vm9, %v456_v63, %v486_v25 }
 0x34f   :  { %492 = vst [vmem:[#allocation12 + $0x18] sm:$0xff] %v470_v24 }
 0x350   :  { %494 = vst [vmem:[#allocation12 + $0x28] sm:$0xff] %v488_v26 }
 0x351   :  { %507 = dma.vmem_to_hbm [thread:$0]  %s500_s11, 768, %s502_s12, [#allocation6], %s702_s22, %s702_s22, %s703_s23  }
 0x352   :  { %696 = dma.done.wait [#allocation6], 768  }
 0x353   :  { %697 = vsyncadd [#allocation6], 4294966528 }
 0x354   :  { %512 = vsyncpa [#allocation5], 1 }
 0x355   :  { %513 = vsyncpa [#allocation8], 1 }
 0x356   :  { %514 = vsyncpa [#allocation11], 1 }
 0x357   :  { %515 = vsyncpa [#allocation6], 1 }

</bundles_post_ra>
